<compile_context>
chip_gen: v7x
topology: tpu7x:2x2x1
jax: 0.10.0
libtpu: 0.0.40
codegen_flags: <defaults>
</compile_context>

<pallas_src>
import functools

import jax
import jax.numpy as jnp
from jax import lax
from jax.experimental import pallas as pl
from jax.experimental.pallas import tpu as pltpu


def _unified_loss_prototype_kernel(preds_ref, protos_ref, qn2_ref, inv2s2_ref, sel_ref,
                                   selt_ref, lbl_ref, temp_ref,
                                   cls_ref, ws_ref, rsum_ref, pred_ref,
                                   *, A, C, F):
    i = pl.program_id(1)                         # inner ("arbitrary") batch-tile axis

    @pl.when(i == 0)
    def _init():
        cls_ref[...] = jnp.zeros_like(cls_ref)
        ws_ref[...] = jnp.zeros_like(ws_ref)
        rsum_ref[...] = jnp.zeros_like(rsum_ref)

    p = preds_ref[...]                           # (TB, 2F) packed [re | im]
    TB = p.shape[0]
    AC = A * C

    # ---------------- class-loss path ('prototype' / 'L1') --------------------------------
    # Broadcasts hoisted OUT of the unrolled a-loop; sqrt stream on the single EUP slot is
    # the likely critical unit, VPU sub/mul and XLU lane-reduce are filler.
    pr = p[:, :F]
    pim = p[:, F:]
    pr_b = jnp.broadcast_to(pr[:, None, :], (TB, C, F))
    pi_b = jnp.broadcast_to(pim[:, None, :], (TB, C, F))

    def a_body(a, acc):
        start = pl.multiple_of(a * C, 8)         # wrapper asserts C % 8 == 0
        q_a = protos_ref[pl.ds(start, C), :]     # (C, 2F)
        dr = pr_b - q_a[:, :F][None, :, :]       # (TB, C, F)
        di = pi_b - q_a[:, F:][None, :, :]
        dist = jnp.sqrt(dr * dr + di * di)       # 'L1' metric: |z_pred - z_proto|
        return acc + jnp.sum(dist, axis=-1)      # (TB, C)

    dist_sum = lax.fori_loop(0, A, a_body, jnp.zeros((TB, C), jnp.float32), unroll=True)

    temp = temp_ref[0, 0]
    # hoisted: mean over F, mean over A and the -temp scaling folded into one scalar factor
    logits_mean = dist_sum * (-temp / (A * F))                               # (TB, C)

    mx = jnp.max(logits_mean, axis=1, keepdims=True)                         # (TB, 1)
    lse = jnp.log(jnp.sum(jnp.exp(logits_mean - mx), axis=1, keepdims=True)) + mx
    iota_c = lax.broadcasted_iota(jnp.int32, (TB, C), 1)
    onehot = (iota_c == lbl_ref[...]).astype(jnp.float32)                    # (TB, C)
    picked = jnp.sum(logits_mean * onehot, axis=1, keepdims=True)            # (TB, 1)
    cls_ref[...] += jnp.sum(lse - picked, axis=0, keepdims=True)             # (1, 1) partial

    # predicted labels = first argmax over classes (softmax monotone; matches torch argmax)
    is_max = logits_mean == mx
    pred = jnp.min(jnp.where(is_max, iota_c, C), axis=1, keepdims=True)
    pred_ref[...] = pred.astype(jnp.int32)

    # ---------------- GMM path on the MXU (single 2F-deep contractions) --------------------
    q = protos_ref[...]                                                      # (AC, 2F)
    dn_f = (((1,), (1,)), ((), ()))                                          # contract over 2F
    cross = lax.dot_general(p, q, dn_f, preferred_element_type=jnp.float32)  # (TB, AC)
    p_norm2 = jnp.sum(p * p, axis=1, keepdims=True)                          # (TB, 1)
    # NOTE: ||p||^2 + ||q||^2 - 2<p,q> loses precision when pred ~= prototype; clamped at 0.
    dist2 = jnp.maximum(p_norm2 + qn2_ref[...] - 2.0 * cross, 0.0)           # (TB, AC)
    lik = jnp.exp(-dist2 * inv2s2_ref[...])                                  # exact 1/(2s^2+eps)

    dn_k = (((1,), (0,)), ((), ()))
    lik_sum = lax.dot_general(lik, sel_ref[...], dn_k,
                              preferred_element_type=jnp.float32)            # (TB, C)
    inv_norm = pl.reciprocal(lik_sum + 1e-8, approx=True)                    # (TB, C)
    # broadcast 1/sum across the A components via a tiny matmul (no lane-tile relayout)
    resp = lik * lax.dot_general(inv_norm, selt_ref[...], dn_k,
                                 preferred_element_type=jnp.float32)         # (TB, AC)

    dn_b = (((0,), (0,)), ((), ()))                                          # contract over batch
    ws_ref[...] += lax.dot_general(resp, p, dn_b,
                                   preferred_element_type=jnp.float32)       # (AC, 2F) partial
    ones_row = jnp.ones((1, TB), jnp.float32)
    rsum_ref[...] += lax.dot_general(ones_row, resp, dn_k,
                                     preferred_element_type=jnp.float32)     # (1, AC) partial


def unified_loss_prototype(preds_re, preds_im, protos_param, log_sigma, labels,
                           temperature, gmm_lambda, *, tile_b=None, num_cores=None):
    """preds_*: (B, F); protos_param: (2, A, F, C); log_sigma: (A, C); labels: (B,)."""
    B, F = preds_re.shape
    _, A, Fp, C = protos_param.shape
    assert Fp == F
    assert C % 8 == 0, "pl.multiple_of(a*C, 8) alignment hint requires C % 8 == 0"
    AC = A * C

    if tile_b is None:
        # <=512 is safe on all generations (incl. v7x's 64 MiB VMEM); bigger tiles amortize
        # the ~0.35us/step fixed overhead and give the MXU a larger M.
        tile_b = next((t for t in (512, 256, 128, 64, 32, 16, 8) if t <= B and B % t == 0), B)
    assert B % tile_b == 0 and tile_b % 8 == 0
    num_tiles = B // tile_b
    if num_cores is None:
        num_cores = 2 if num_tiles % 2 == 0 else 1     # 2-TC v7x; harmless on v5e/v6e
    assert num_tiles % num_cores == 0
    tpc = num_tiles // num_cores

    # wrapper-side layout plumbing: (A, F, C) -> (A, C, F) -> (A*C, F), then pack [re | im]
    proto_re = jnp.transpose(protos_param[0], (0, 2, 1)).reshape(AC, F)
    proto_im = jnp.transpose(protos_param[1], (0, 2, 1)).reshape(AC, F)
    protos_packed = jnp.concatenate([proto_re, proto_im], axis=1)            # (AC, 2F)
    preds_packed = jnp.concatenate([preds_re, preds_im], axis=1)             # (B, 2F)

    # grid-invariant GMM constants (hoisted out of the kernel; exact, not approx):
    q_norm2 = jnp.sum(protos_packed * protos_packed, axis=1).reshape(1, AC)
    sigma = jnp.exp(log_sigma.astype(jnp.float32)).reshape(1, AC)
    inv_2s2 = 1.0 / (2.0 * sigma * sigma + 1e-8)
    comp = jnp.arange(AC, dtype=jnp.int32) % C
    sel = (comp[:, None] == jnp.arange(C, dtype=jnp.int32)[None, :]).astype(jnp.float32)  # (AC, C)
    selt = sel.T                                                                          # (C, AC)

    labels_col = labels.astype(jnp.int32).reshape(B, 1)
    temp2d = jnp.asarray(temperature, jnp.float32).reshape(1, 1)

    kernel = functools.partial(_unified_loss_prototype_kernel, A=A, C=C, F=F)

    tile_idx = lambda c, i: (c * tpc + i, 0)
    resident = lambda c, i: (0, 0)
    per_core = lambda c, i: (c, 0, 0)

    cls_part, ws_part, rsum_part, pred = pl.pallas_call(
        kernel,
        grid=(num_cores, tpc),
        out_shape=(jax.ShapeDtypeStruct((num_cores, 1, 1), jnp.float32),      # class-loss partial
                   jax.ShapeDtypeStruct((num_cores, AC, 2 * F), jnp.float32), # GMM weighted sums
                   jax.ShapeDtypeStruct((num_cores, 1, AC), jnp.float32),     # responsibility sums
                   jax.ShapeDtypeStruct((B, 1), jnp.int32)),                  # predicted labels
        in_specs=[
            pl.BlockSpec((tile_b, 2 * F), tile_idx),                # preds packed [re|im]
            pl.BlockSpec((AC, 2 * F), resident),                    # prototypes packed (resident)
            pl.BlockSpec((1, AC), resident),                        # q_norm2 (resident)
            pl.BlockSpec((1, AC), resident),                        # inv_2s2 (resident, exact)
            pl.BlockSpec((AC, C), resident),                        # sel (resident)
            pl.BlockSpec((C, AC), resident),                        # selT (resident)
            pl.BlockSpec((tile_b, 1), tile_idx),                    # labels int32
            pl.BlockSpec(memory_space=pltpu.MemorySpace.SMEM),      # temperature (1,1)
        ],
        out_specs=(
            pl.BlockSpec((None, 1, 1), per_core),
            pl.BlockSpec((None, AC, 2 * F), per_core),
            pl.BlockSpec((None, 1, AC), per_core),
            pl.BlockSpec((tile_b, 1), tile_idx),
        ),
        compiler_params=pltpu.CompilerParams(
            dimension_semantics=("parallel", "arbitrary"),
            vmem_limit_bytes=40 * 1024 * 1024),                     # fits v7x 64 MiB w/ headroom
    )(preds_packed, protos_packed, q_norm2, inv_2s2, sel, selt, labels_col, temp2d)

    # tiny finalize in plain JAX: reduce per-core partials + prototype-update loss (exact divides)
    class_loss = jnp.sum(cls_part) / B
    ws = jnp.sum(ws_part, axis=0)                                   # (AC, 2F)
    rsum = jnp.sum(rsum_part, axis=0).reshape(AC, 1)                # (AC, 1)
    new_protos = ws / (rsum + 1e-8)
    d = new_protos - protos_packed
    loss_proto = jnp.sum(d * d) / (AC * F)                          # mean over A*F*C complex elems
    total = class_loss + gmm_lambda * loss_proto
    return total, pred[:, 0]


def reference_loss(preds_c, protos_param, temp, log_sigma, labels, gmm_lambda):
    """Pure-JAX mirror of the PyTorch 'prototype' / 'L1' branch for cross-checking."""
    protos_c = protos_param[0] + 1j * protos_param[1]          # (A, F, C) complex64
    pe = preds_c[:, None, :, None]                             # (B,1,F,1)
    qe = protos_c[None]                                        # (1,A,F,C)
    dist = jnp.abs(pe - qe)                                    # (B,A,F,C)
    logits = -temp * dist.mean(axis=2)                         # (B,A,C)
    lm = logits.mean(axis=1)                                   # (B,C)
    logp = jax.nn.log_softmax(lm, axis=1)
    class_loss = -jnp.mean(logp[jnp.arange(lm.shape[0]), labels])
    d2 = (jnp.abs(pe - qe) ** 2).sum(axis=2)                   # (B,A,C)
    sigma = jnp.exp(log_sigma)
    lik = jnp.exp(-d2 / (2.0 * sigma ** 2 + 1e-8))
    resp = lik / (lik.sum(axis=1, keepdims=True) + 1e-8)
    ws = jnp.einsum('bac,bf->afc', resp.astype(jnp.complex64), preds_c)
    sr = resp.sum(axis=0)
    newp = ws / (sr[:, None, :] + 1e-8)
    lp = jnp.mean(jnp.abs(newp - protos_c) ** 2)
    total = class_loss + gmm_lambda * lp
    pred = jnp.argmax(jax.nn.softmax(lm, axis=1), axis=1)
    return total, pred


if __name__ == "__main__":
    B, F, C, A = 16, 128, 8, 5          # batch, dist_features, num_classes, gmm components
    temperature = 1.0
    gmm_lambda = 0.01

    key = jax.random.PRNGKey(0)
    k1, k2, k3, k4 = jax.random.split(key, 4)
    preds_re = jax.random.normal(k1, (B, F), jnp.float32)
    preds_im = jax.random.normal(k2, (B, F), jnp.float32)
    # prototypes_param ~ randn(2, 5, dist_features, num_classes)
    protos_param = jax.random.normal(k3, (2, A, F, C), jnp.float32)
    labels = jax.random.randint(k4, (B,), 0, C, jnp.int32)
    log_sigma = jnp.zeros((A, C), jnp.float32)                 # log_sigma_param init = zeros

    # tile_b=8 -> 2 tiles -> exercises the 2-core partial path and the accumulate/init pattern
    loss, pred = unified_loss_prototype(preds_re, preds_im, protos_param, log_sigma,
                                        labels, temperature, gmm_lambda, tile_b=8)
    loss = jax.block_until_ready(loss)
    pred = jax.block_until_ready(pred)

    ref_loss, ref_pred = reference_loss(preds_re + 1j * preds_im, protos_param,
                                        temperature, log_sigma, labels, gmm_lambda)
    assert jnp.allclose(loss, ref_loss, rtol=1e-3, atol=1e-4), (loss, ref_loss)
    assert jnp.array_equal(pred, ref_pred), (pred, ref_pred)
    print("KERNEL_OK")
</pallas_src>

<mosaic_0001>
module attributes {stable_mosaic.version = 11 : i64} {
  func.func @_unified_loss_prototype_kernel(%arg0: i32, %arg1: i32, %arg2: memref<8x256xf32, #tpu.memory_space<vmem>>, %arg3: memref<40x256xf32, #tpu.memory_space<vmem>>, %arg4: memref<1x40xf32, #tpu.memory_space<vmem>>, %arg5: memref<1x40xf32, #tpu.memory_space<vmem>>, %arg6: memref<40x8xf32, #tpu.memory_space<vmem>>, %arg7: memref<8x40xf32, #tpu.memory_space<vmem>>, %arg8: memref<8x1xi32, #tpu.memory_space<vmem>>, %arg9: memref<1x1xf32, #tpu.memory_space<smem>>, %arg10: memref<1x1x1xf32, #tpu.memory_space<vmem>>, %arg11: memref<1x40x256xf32, #tpu.memory_space<vmem>>, %arg12: memref<1x1x40xf32, #tpu.memory_space<vmem>>, %arg13: memref<8x1xi32, #tpu.memory_space<vmem>>) attributes {dimension_semantics = [#tpu.dimension_semantics<parallel>, #tpu.dimension_semantics<arbitrary>], iteration_bounds = array<i64: 2, 1>, scalar_prefetch = 0 : i64, scratch_operands = 0 : i64, tpu.core_type = #tpu.core_type<tc>, window_params = [{transform_indices = @transform_0, window_bounds = array<i64: 8, 256>}, {pipeline_mode = #tpu.pipeline_mode<synchronous>, transform_indices = @transform_1, window_bounds = array<i64: 40, 256>}, {pipeline_mode = #tpu.pipeline_mode<synchronous>, transform_indices = @transform_2, window_bounds = array<i64: 1, 40>}, {pipeline_mode = #tpu.pipeline_mode<synchronous>, transform_indices = @transform_3, window_bounds = array<i64: 1, 40>}, {pipeline_mode = #tpu.pipeline_mode<synchronous>, transform_indices = @transform_4, window_bounds = array<i64: 40, 8>}, {pipeline_mode = #tpu.pipeline_mode<synchronous>, transform_indices = @transform_5, window_bounds = array<i64: 8, 40>}, {transform_indices = @transform_6, window_bounds = array<i64: 8, 1>}, {transform_indices = @transform_7, window_bounds = array<i64: 1, 1>}, {transform_indices = @transform_8, window_bounds = array<i64: 1, 1, 1>}, {transform_indices = @transform_9, window_bounds = array<i64: 1, 40, 256>}, {transform_indices = @transform_10, window_bounds = array<i64: 1, 1, 40>}, {transform_indices = @transform_11, window_bounds = array<i64: 8, 1>}]} {
    %c0_i32 = arith.constant 0 : i32
    %0 = arith.cmpi eq, %arg1, %c0_i32 : i32
    %1 = arith.extui %0 : i1 to i32
    %c0_i32_0 = arith.constant 0 : i32
    %2 = arith.cmpi ne, %1, %c0_i32_0 : i32
    scf.if %2 {
      %cst_70 = arith.constant 0.000000e+00 : f32
      %185 = vector.broadcast %cst_70 : f32 to vector<1x1xf32>
      %c0_71 = arith.constant 0 : index
      %c0_72 = arith.constant 0 : index
      %c0_73 = arith.constant 0 : index
      %186 = vector.load %arg10[%c0_71, %c0_72, %c0_73] : memref<1x1x1xf32, #tpu.memory_space<vmem>>, vector<1x1x1xf32>
      %187 = vector.shape_cast %186 : vector<1x1x1xf32> to vector<1x1xf32>
      %188 = vector.shape_cast %185 : vector<1x1xf32> to vector<1x1x1xf32>
      tpu.vector_store %arg10[%c0_71, %c0_72, %c0_73], %188 {strides = array<i32>} : memref<1x1x1xf32, #tpu.memory_space<vmem>>, vector<1x1x1xf32>,
      %cst_74 = arith.constant 0.000000e+00 : f32
      %189 = vector.broadcast %cst_74 : f32 to vector<40x256xf32>
      %c0_75 = arith.constant 0 : index
      %c0_76 = arith.constant 0 : index
      %c0_77 = arith.constant 0 : index
      %190 = vector.load %arg11[%c0_75, %c0_76, %c0_77] : memref<1x40x256xf32, #tpu.memory_space<vmem>>, vector<1x40x256xf32>
      %191 = vector.shape_cast %190 : vector<1x40x256xf32> to vector<40x256xf32>
      %192 = vector.shape_cast %189 : vector<40x256xf32> to vector<1x40x256xf32>
      tpu.vector_store %arg11[%c0_75, %c0_76, %c0_77], %192 {strides = array<i32>} : memref<1x40x256xf32, #tpu.memory_space<vmem>>, vector<1x40x256xf32>,
      %cst_78 = arith.constant 0.000000e+00 : f32
      %193 = vector.broadcast %cst_78 : f32 to vector<1x40xf32>
      %c0_79 = arith.constant 0 : index
      %c0_80 = arith.constant 0 : index
      %c0_81 = arith.constant 0 : index
      %194 = vector.load %arg12[%c0_79, %c0_80, %c0_81] : memref<1x1x40xf32, #tpu.memory_space<vmem>>, vector<1x1x40xf32>
      %195 = vector.shape_cast %194 : vector<1x1x40xf32> to vector<1x40xf32>
      %196 = vector.shape_cast %193 : vector<1x40xf32> to vector<1x1x40xf32>
      tpu.vector_store %arg12[%c0_79, %c0_80, %c0_81], %196 {strides = array<i32>} : memref<1x1x40xf32, #tpu.memory_space<vmem>>, vector<1x1x40xf32>,
    } else {
    }
    %c0 = arith.constant 0 : index
    %c0_1 = arith.constant 0 : index
    %3 = vector.load %arg2[%c0, %c0_1] : memref<8x256xf32, #tpu.memory_space<vmem>>, vector<8x256xf32>
    %4 = vector.extract_strided_slice %3 {offsets = [0, 0], sizes = [8, 128], strides = [1, 1]} : vector<8x256xf32> to vector<8x128xf32>
    %5 = vector.extract_strided_slice %3 {offsets = [0, 128], sizes = [8, 128], strides = [1, 1]} : vector<8x256xf32> to vector<8x128xf32>
    %6 = vector.shape_cast %4 : vector<8x128xf32> to vector<8x1x128xf32>
    %7 = vector.shape_cast %6 : vector<8x1x128xf32> to vector<8x1x128xf32>
    %8 = vector.broadcast %7 : vector<8x1x128xf32> to vector<8x8x128xf32>
    %9 = vector.shape_cast %5 : vector<8x128xf32> to vector<8x1x128xf32>
    %10 = vector.shape_cast %9 : vector<8x1x128xf32> to vector<8x1x128xf32>
    %11 = vector.broadcast %10 : vector<8x1x128xf32> to vector<8x8x128xf32>
    %cst = arith.constant 0.000000e+00 : f32
    %12 = vector.broadcast %cst : f32 to vector<8x8xf32>
    %c0_i32_2 = arith.constant 0 : i32
    %c8_i32 = arith.constant 8 : i32
    %13 = arith.muli %c0_i32_2, %c8_i32 : i32
    %14 = tpu.assume_multiple %13, 8 : i32
    %15 = arith.index_cast %14 : i32 to index
    %c0_3 = arith.constant 0 : index
    %16 = vector.load %arg3[%15, %c0_3] : memref<40x256xf32, #tpu.memory_space<vmem>>, vector<8x256xf32>
    %17 = vector.extract_strided_slice %16 {offsets = [0, 0], sizes = [8, 128], strides = [1, 1]} : vector<8x256xf32> to vector<8x128xf32>
    %18 = vector.shape_cast %17 : vector<8x128xf32> to vector<1x8x128xf32>
    %19 = vector.broadcast %18 : vector<1x8x128xf32> to vector<8x8x128xf32>
    %20 = arith.subf %8, %19 : vector<8x8x128xf32>
    %21 = vector.extract_strided_slice %16 {offsets = [0, 128], sizes = [8, 128], strides = [1, 1]} : vector<8x256xf32> to vector<8x128xf32>
    %22 = vector.shape_cast %21 : vector<8x128xf32> to vector<1x8x128xf32>
    %23 = vector.broadcast %22 : vector<1x8x128xf32> to vector<8x8x128xf32>
    %24 = arith.subf %11, %23 : vector<8x8x128xf32>
    %25 = arith.mulf %20, %20 : vector<8x8x128xf32>
    %26 = arith.mulf %24, %24 : vector<8x8x128xf32>
    %27 = arith.addf %25, %26 : vector<8x8x128xf32>
    %28 = math.sqrt %27 : vector<8x8x128xf32>
    %cst_4 = arith.constant dense<0.000000e+00> : vector<8x8xf32>
    %29 = vector.multi_reduction <add>, %28, %cst_4 [2] : vector<8x8x128xf32> to vector<8x8xf32>
    %30 = arith.addf %12, %29 : vector<8x8xf32>
    %c1_i32 = arith.constant 1 : i32
    %c8_i32_5 = arith.constant 8 : i32
    %31 = arith.muli %c1_i32, %c8_i32_5 : i32
    %32 = tpu.assume_multiple %31, 8 : i32
    %33 = arith.index_cast %32 : i32 to index
    %c0_6 = arith.constant 0 : index
    %34 = vector.load %arg3[%33, %c0_6] : memref<40x256xf32, #tpu.memory_space<vmem>>, vector<8x256xf32>
    %35 = vector.extract_strided_slice %34 {offsets = [0, 0], sizes = [8, 128], strides = [1, 1]} : vector<8x256xf32> to vector<8x128xf32>
    %36 = vector.shape_cast %35 : vector<8x128xf32> to vector<1x8x128xf32>
    %37 = vector.broadcast %36 : vector<1x8x128xf32> to vector<8x8x128xf32>
    %38 = arith.subf %8, %37 : vector<8x8x128xf32>
    %39 = vector.extract_strided_slice %34 {offsets = [0, 128], sizes = [8, 128], strides = [1, 1]} : vector<8x256xf32> to vector<8x128xf32>
    %40 = vector.shape_cast %39 : vector<8x128xf32> to vector<1x8x128xf32>
    %41 = vector.broadcast %40 : vector<1x8x128xf32> to vector<8x8x128xf32>
    %42 = arith.subf %11, %41 : vector<8x8x128xf32>
    %43 = arith.mulf %38, %38 : vector<8x8x128xf32>
    %44 = arith.mulf %42, %42 : vector<8x8x128xf32>
    %45 = arith.addf %43, %44 : vector<8x8x128xf32>
    %46 = math.sqrt %45 : vector<8x8x128xf32>
    %cst_7 = arith.constant dense<0.000000e+00> : vector<8x8xf32>
    %47 = vector.multi_reduction <add>, %46, %cst_7 [2] : vector<8x8x128xf32> to vector<8x8xf32>
    %48 = arith.addf %30, %47 : vector<8x8xf32>
    %c2_i32 = arith.constant 2 : i32
    %c8_i32_8 = arith.constant 8 : i32
    %49 = arith.muli %c2_i32, %c8_i32_8 : i32
    %50 = tpu.assume_multiple %49, 8 : i32
    %51 = arith.index_cast %50 : i32 to index
    %c0_9 = arith.constant 0 : index
    %52 = vector.load %arg3[%51, %c0_9] : memref<40x256xf32, #tpu.memory_space<vmem>>, vector<8x256xf32>
    %53 = vector.extract_strided_slice %52 {offsets = [0, 0], sizes = [8, 128], strides = [1, 1]} : vector<8x256xf32> to vector<8x128xf32>
    %54 = vector.shape_cast %53 : vector<8x128xf32> to vector<1x8x128xf32>
    %55 = vector.broadcast %54 : vector<1x8x128xf32> to vector<8x8x128xf32>
    %56 = arith.subf %8, %55 : vector<8x8x128xf32>
    %57 = vector.extract_strided_slice %52 {offsets = [0, 128], sizes = [8, 128], strides = [1, 1]} : vector<8x256xf32> to vector<8x128xf32>
    %58 = vector.shape_cast %57 : vector<8x128xf32> to vector<1x8x128xf32>
    %59 = vector.broadcast %58 : vector<1x8x128xf32> to vector<8x8x128xf32>
    %60 = arith.subf %11, %59 : vector<8x8x128xf32>
    %61 = arith.mulf %56, %56 : vector<8x8x128xf32>
    %62 = arith.mulf %60, %60 : vector<8x8x128xf32>
    %63 = arith.addf %61, %62 : vector<8x8x128xf32>
    %64 = math.sqrt %63 : vector<8x8x128xf32>
    %cst_10 = arith.constant dense<0.000000e+00> : vector<8x8xf32>
    %65 = vector.multi_reduction <add>, %64, %cst_10 [2] : vector<8x8x128xf32> to vector<8x8xf32>
    %66 = arith.addf %48, %65 : vector<8x8xf32>
    %c3_i32 = arith.constant 3 : i32
    %c8_i32_11 = arith.constant 8 : i32
    %67 = arith.muli %c3_i32, %c8_i32_11 : i32
    %68 = tpu.assume_multiple %67, 8 : i32
    %69 = arith.index_cast %68 : i32 to index
    %c0_12 = arith.constant 0 : index
    %70 = vector.load %arg3[%69, %c0_12] : memref<40x256xf32, #tpu.memory_space<vmem>>, vector<8x256xf32>
    %71 = vector.extract_strided_slice %70 {offsets = [0, 0], sizes = [8, 128], strides = [1, 1]} : vector<8x256xf32> to vector<8x128xf32>
    %72 = vector.shape_cast %71 : vector<8x128xf32> to vector<1x8x128xf32>
    %73 = vector.broadcast %72 : vector<1x8x128xf32> to vector<8x8x128xf32>
    %74 = arith.subf %8, %73 : vector<8x8x128xf32>
    %75 = vector.extract_strided_slice %70 {offsets = [0, 128], sizes = [8, 128], strides = [1, 1]} : vector<8x256xf32> to vector<8x128xf32>
    %76 = vector.shape_cast %75 : vector<8x128xf32> to vector<1x8x128xf32>
    %77 = vector.broadcast %76 : vector<1x8x128xf32> to vector<8x8x128xf32>
    %78 = arith.subf %11, %77 : vector<8x8x128xf32>
    %79 = arith.mulf %74, %74 : vector<8x8x128xf32>
    %80 = arith.mulf %78, %78 : vector<8x8x128xf32>
    %81 = arith.addf %79, %80 : vector<8x8x128xf32>
    %82 = math.sqrt %81 : vector<8x8x128xf32>
    %cst_13 = arith.constant dense<0.000000e+00> : vector<8x8xf32>
    %83 = vector.multi_reduction <add>, %82, %cst_13 [2] : vector<8x8x128xf32> to vector<8x8xf32>
    %84 = arith.addf %66, %83 : vector<8x8xf32>
    %c4_i32 = arith.constant 4 : i32
    %c8_i32_14 = arith.constant 8 : i32
    %85 = arith.muli %c4_i32, %c8_i32_14 : i32
    %86 = tpu.assume_multiple %85, 8 : i32
    %87 = arith.index_cast %86 : i32 to index
    %c0_15 = arith.constant 0 : index
    %88 = vector.load %arg3[%87, %c0_15] : memref<40x256xf32, #tpu.memory_space<vmem>>, vector<8x256xf32>
    %89 = vector.extract_strided_slice %88 {offsets = [0, 0], sizes = [8, 128], strides = [1, 1]} : vector<8x256xf32> to vector<8x128xf32>
    %90 = vector.shape_cast %89 : vector<8x128xf32> to vector<1x8x128xf32>
    %91 = vector.broadcast %90 : vector<1x8x128xf32> to vector<8x8x128xf32>
    %92 = arith.subf %8, %91 : vector<8x8x128xf32>
    %93 = vector.extract_strided_slice %88 {offsets = [0, 128], sizes = [8, 128], strides = [1, 1]} : vector<8x256xf32> to vector<8x128xf32>
    %94 = vector.shape_cast %93 : vector<8x128xf32> to vector<1x8x128xf32>
    %95 = vector.broadcast %94 : vector<1x8x128xf32> to vector<8x8x128xf32>
    %96 = arith.subf %11, %95 : vector<8x8x128xf32>
    %97 = arith.mulf %92, %92 : vector<8x8x128xf32>
    %98 = arith.mulf %96, %96 : vector<8x8x128xf32>
    %99 = arith.addf %97, %98 : vector<8x8x128xf32>
    %100 = math.sqrt %99 : vector<8x8x128xf32>
    %cst_16 = arith.constant dense<0.000000e+00> : vector<8x8xf32>
    %101 = vector.multi_reduction <add>, %100, %cst_16 [2] : vector<8x8x128xf32> to vector<8x8xf32>
    %102 = arith.addf %84, %101 : vector<8x8xf32>
    %c5_i32 = arith.constant 5 : i32
    %c0_17 = arith.constant 0 : index
    %c0_18 = arith.constant 0 : index
    %103 = memref.load %arg9[%c0_17, %c0_18] : memref<1x1xf32, #tpu.memory_space<smem>>
    %cst_19 = arith.constant 0.000000e+00 : f32
    %104 = arith.subf %cst_19, %103 : f32
    %cst_20 = arith.constant 6.400000e+02 : f32
    %105 = arith.divf %104, %cst_20 : f32
    %106 = vector.broadcast %105 : f32 to vector<8x8xf32>
    %107 = arith.mulf %102, %106 : vector<8x8xf32>
    %cst_21 = arith.constant dense<0xFF800000> : vector<8xf32>
    %108 = vector.multi_reduction <maximumf>, %107, %cst_21 [1] : vector<8x8xf32> to vector<8xf32>
    %109 = vector.shape_cast %108 : vector<8xf32> to vector<8x1xf32>
    %110 = vector.broadcast %109 : vector<8x1xf32> to vector<8x8xf32>
    %111 = arith.subf %107, %110 : vector<8x8xf32>
    %112 = math.exp %111 : vector<8x8xf32>
    %cst_22 = arith.constant dense<0.000000e+00> : vector<8xf32>
    %113 = vector.multi_reduction <add>, %112, %cst_22 [1] : vector<8x8xf32> to vector<8xf32>
    %114 = vector.shape_cast %113 : vector<8xf32> to vector<8x1xf32>
    %115 = math.log %114 : vector<8x1xf32>
    %116 = arith.addf %115, %109 : vector<8x1xf32>
    %117 = tpu.iota {dimensions = array<i32: 1>} : vector<8x8xi32>
    %c0_23 = arith.constant 0 : index
    %c0_24 = arith.constant 0 : index
    %118 = vector.load %arg8[%c0_23, %c0_24] : memref<8x1xi32, #tpu.memory_space<vmem>>, vector<8x1xi32>
    %119 = vector.broadcast %118 : vector<8x1xi32> to vector<8x8xi32>
    %120 = arith.cmpi eq, %117, %119 : vector<8x8xi32>
    %121 = arith.extui %120 : vector<8x8xi1> to vector<8x8xi32>
    %122 = arith.sitofp %121 : vector<8x8xi32> to vector<8x8xf32>
    %123 = arith.mulf %107, %122 : vector<8x8xf32>
    %cst_25 = arith.constant dense<0.000000e+00> : vector<8xf32>
    %124 = vector.multi_reduction <add>, %123, %cst_25 [1] : vector<8x8xf32> to vector<8xf32>
    %125 = vector.shape_cast %124 : vector<8xf32> to vector<8x1xf32>
    %c0_26 = arith.constant 0 : index
    %c0_27 = arith.constant 0 : index
    %c0_28 = arith.constant 0 : index
    %126 = vector.load %arg10[%c0_26, %c0_27, %c0_28] : memref<1x1x1xf32, #tpu.memory_space<vmem>>, vector<1x1x1xf32>
    %127 = vector.shape_cast %126 : vector<1x1x1xf32> to vector<1x1xf32>
    %128 = arith.subf %116, %125 : vector<8x1xf32>
    %cst_29 = arith.constant dense<0.000000e+00> : vector<1xf32>
    %129 = vector.multi_reduction <add>, %128, %cst_29 [0] : vector<8x1xf32> to vector<1xf32>
    %130 = vector.shape_cast %129 : vector<1xf32> to vector<1x1xf32>
    %131 = arith.addf %127, %130 : vector<1x1xf32>
    %c0_30 = arith.constant 0 : index
    %c0_31 = arith.constant 0 : index
    %c0_32 = arith.constant 0 : index
    %132 = vector.load %arg10[%c0_30, %c0_31, %c0_32] : memref<1x1x1xf32, #tpu.memory_space<vmem>>, vector<1x1x1xf32>
    %133 = vector.shape_cast %132 : vector<1x1x1xf32> to vector<1x1xf32>
    %134 = vector.shape_cast %131 : vector<1x1xf32> to vector<1x1x1xf32>
    tpu.vector_store %arg10[%c0_30, %c0_31, %c0_32], %134 {strides = array<i32>} : memref<1x1x1xf32, #tpu.memory_space<vmem>>, vector<1x1x1xf32>,
    %135 = vector.broadcast %109 : vector<8x1xf32> to vector<8x8xf32>
    %136 = arith.cmpf oeq, %107, %135 : vector<8x8xf32>
    %c8_i32_33 = arith.constant 8 : i32
    %137 = vector.broadcast %c8_i32_33 : i32 to vector<8x8xi32>
    %138 = arith.select %136, %117, %137 : vector<8x8xi1>, vector<8x8xi32>
    %cst_34 = arith.constant dense<2147483647> : vector<8xi32>
    %139 = vector.multi_reduction <minsi>, %138, %cst_34 [1] : vector<8x8xi32> to vector<8xi32>
    %140 = vector.shape_cast %139 : vector<8xi32> to vector<8x1xi32>
    %c0_35 = arith.constant 0 : index
    %c0_36 = arith.constant 0 : index
    %141 = vector.load %arg13[%c0_35, %c0_36] : memref<8x1xi32, #tpu.memory_space<vmem>>, vector<8x1xi32>
    tpu.vector_store %arg13[%c0_35, %c0_36], %140 {strides = array<i32>} : memref<8x1xi32, #tpu.memory_space<vmem>>, vector<8x1xi32>,
    %c0_37 = arith.constant 0 : index
    %c0_38 = arith.constant 0 : index
    %142 = vector.load %arg3[%c0_37, %c0_38] : memref<40x256xf32, #tpu.memory_space<vmem>>, vector<40x256xf32>
    %cst_39 = arith.constant dense<0.000000e+00> : vector<8x40xf32>
    %143 = tpu.matmul %3, %142, %cst_39 {dimension_numbers = #tpu.dot_dimension_numbers<[1], [1], [0], [0], [0, 0, 1, 0], [], []>} : vector<8x256xf32>, vector<40x256xf32>, vector<8x40xf32> -> vector<8x40xf32>
    %144 = arith.mulf %3, %3 : vector<8x256xf32>
    %cst_40 = arith.constant dense<0.000000e+00> : vector<8xf32>
    %145 = vector.multi_reduction <add>, %144, %cst_40 [1] : vector<8x256xf32> to vector<8xf32>
    %146 = vector.shape_cast %145 : vector<8xf32> to vector<8x1xf32>
    %c0_41 = arith.constant 0 : index
    %c0_42 = arith.constant 0 : index
    %147 = vector.load %arg4[%c0_41, %c0_42] : memref<1x40xf32, #tpu.memory_space<vmem>>, vector<1x40xf32>
    %148 = vector.broadcast %146 : vector<8x1xf32> to vector<8x40xf32>
    %149 = vector.broadcast %147 : vector<1x40xf32> to vector<8x40xf32>
    %150 = arith.addf %148, %149 : vector<8x40xf32>
    %cst_43 = arith.constant 2.000000e+00 : f32
    %151 = vector.broadcast %cst_43 : f32 to vector<8x40xf32>
    %152 = arith.mulf %151, %143 : vector<8x40xf32>
    %153 = arith.subf %150, %152 : vector<8x40xf32>
    %cst_44 = arith.constant 0.000000e+00 : f32
    %154 = vector.broadcast %cst_44 : f32 to vector<8x40xf32>
    %155 = arith.maximumf %153, %154 : vector<8x40xf32>
    %cst_45 = arith.constant 0.000000e+00 : f32
    %156 = vector.broadcast %cst_45 : f32 to vector<8x40xf32>
    %157 = arith.subf %156, %155 : vector<8x40xf32>
    %c0_46 = arith.constant 0 : index
    %c0_47 = arith.constant 0 : index
    %158 = vector.load %arg5[%c0_46, %c0_47] : memref<1x40xf32, #tpu.memory_space<vmem>>, vector<1x40xf32>
    %159 = vector.broadcast %158 : vector<1x40xf32> to vector<8x40xf32>
    %160 = arith.mulf %157, %159 : vector<8x40xf32>
    %161 = math.exp %160 : vector<8x40xf32>
    %c0_48 = arith.constant 0 : index
    %c0_49 = arith.constant 0 : index
    %162 = vector.load %arg6[%c0_48, %c0_49] : memref<40x8xf32, #tpu.memory_space<vmem>>, vector<40x8xf32>
    %cst_50 = arith.constant dense<0.000000e+00> : vector<8x8xf32>
    %163 = tpu.matmul %161, %162, %cst_50 {dimension_numbers = #tpu.dot_dimension_numbers<[1], [0], [0], [1], [0, 0, 1, 1], [], []>} : vector<8x40xf32>, vector<40x8xf32>, vector<8x8xf32> -> vector<8x8xf32>
    %cst_51 = arith.constant 9.99999993E-9 : f32
    %164 = vector.broadcast %cst_51 : f32 to vector<8x8xf32>
    %165 = arith.addf %163, %164 : vector<8x8xf32>
    %166 = tpu.reciprocal %165 {approx = true} : vector<8x8xf32> -> vector<8x8xf32>
    %c0_52 = arith.constant 0 : index
    %c0_53 = arith.constant 0 : index
    %167 = vector.load %arg7[%c0_52, %c0_53] : memref<8x40xf32, #tpu.memory_space<vmem>>, vector<8x40xf32>
    %cst_54 = arith.constant dense<0.000000e+00> : vector<8x40xf32>
    %168 = tpu.matmul %166, %167, %cst_54 {dimension_numbers = #tpu.dot_dimension_numbers<[1], [0], [0], [1], [0, 0, 1, 1], [], []>} : vector<8x8xf32>, vector<8x40xf32>, vector<8x40xf32> -> vector<8x40xf32>
    %169 = arith.mulf %161, %168 : vector<8x40xf32>
    %c0_55 = arith.constant 0 : index
    %c0_56 = arith.constant 0 : index
    %c0_57 = arith.constant 0 : index
    %170 = vector.load %arg11[%c0_55, %c0_56, %c0_57] : memref<1x40x256xf32, #tpu.memory_space<vmem>>, vector<1x40x256xf32>
    %171 = vector.shape_cast %170 : vector<1x40x256xf32> to vector<40x256xf32>
    %cst_58 = arith.constant dense<0.000000e+00> : vector<40x256xf32>
    %172 = tpu.matmul %169, %3, %cst_58 {dimension_numbers = #tpu.dot_dimension_numbers<[0], [0], [1], [1], [0, 1, 1, 1], [], []>} : vector<8x40xf32>, vector<8x256xf32>, vector<40x256xf32> -> vector<40x256xf32>
    %173 = arith.addf %171, %172 : vector<40x256xf32>
    %c0_59 = arith.constant 0 : index
    %c0_60 = arith.constant 0 : index
    %c0_61 = arith.constant 0 : index
    %174 = vector.load %arg11[%c0_59, %c0_60, %c0_61] : memref<1x40x256xf32, #tpu.memory_space<vmem>>, vector<1x40x256xf32>
    %175 = vector.shape_cast %174 : vector<1x40x256xf32> to vector<40x256xf32>
    %176 = vector.shape_cast %173 : vector<40x256xf32> to vector<1x40x256xf32>
    tpu.vector_store %arg11[%c0_59, %c0_60, %c0_61], %176 {strides = array<i32>} : memref<1x40x256xf32, #tpu.memory_space<vmem>>, vector<1x40x256xf32>,
    %cst_62 = arith.constant 1.000000e+00 : f32
    %177 = vector.broadcast %cst_62 : f32 to vector<1x8xf32>
    %c0_63 = arith.constant 0 : index
    %c0_64 = arith.constant 0 : index
    %c0_65 = arith.constant 0 : index
    %178 = vector.load %arg12[%c0_63, %c0_64, %c0_65] : memref<1x1x40xf32, #tpu.memory_space<vmem>>, vector<1x1x40xf32>
    %179 = vector.shape_cast %178 : vector<1x1x40xf32> to vector<1x40xf32>
    %cst_66 = arith.constant dense<0.000000e+00> : vector<1x40xf32>
    %180 = tpu.matmul %177, %169, %cst_66 {dimension_numbers = #tpu.dot_dimension_numbers<[1], [0], [0], [1], [0, 0, 1, 1], [], []>} : vector<1x8xf32>, vector<8x40xf32>, vector<1x40xf32> -> vector<1x40xf32>
    %181 = arith.addf %179, %180 : vector<1x40xf32>
    %c0_67 = arith.constant 0 : index
    %c0_68 = arith.constant 0 : index
    %c0_69 = arith.constant 0 : index
    %182 = vector.load %arg12[%c0_67, %c0_68, %c0_69] : memref<1x1x40xf32, #tpu.memory_space<vmem>>, vector<1x1x40xf32>
    %183 = vector.shape_cast %182 : vector<1x1x40xf32> to vector<1x40xf32>
    %184 = vector.shape_cast %181 : vector<1x40xf32> to vector<1x1x40xf32>
    tpu.vector_store %arg12[%c0_67, %c0_68, %c0_69], %184 {strides = array<i32>} : memref<1x1x40xf32, #tpu.memory_space<vmem>>, vector<1x1x40xf32>,
    return
  }
  func.func @transform_0(%arg0: i32, %arg1: i32) -> (i32, i32) {
    %c1_i32 = arith.constant 1 : i32
    %0 = arith.muli %arg0, %c1_i32 : i32
    %1 = arith.addi %0, %arg1 : i32
    %c0_i32 = arith.constant 0 : i32
    %c0_i32_0 = arith.constant 0 : i32
    return %1, %c0_i32 : i32, i32
  }
  func.func @transform_1(%arg0: i32, %arg1: i32) -> (i32, i32) {
    %c0_i32 = arith.constant 0 : i32
    %c0_i32_0 = arith.constant 0 : i32
    %c0_i32_1 = arith.constant 0 : i32
    return %c0_i32, %c0_i32_0 : i32, i32
  }
  func.func @transform_2(%arg0: i32, %arg1: i32) -> (i32, i32) {
    %c0_i32 = arith.constant 0 : i32
    %c0_i32_0 = arith.constant 0 : i32
    %c0_i32_1 = arith.constant 0 : i32
    return %c0_i32, %c0_i32_0 : i32, i32
  }
  func.func @transform_3(%arg0: i32, %arg1: i32) -> (i32, i32) {
    %c0_i32 = arith.constant 0 : i32
    %c0_i32_0 = arith.constant 0 : i32
    %c0_i32_1 = arith.constant 0 : i32
    return %c0_i32, %c0_i32_0 : i32, i32
  }
  func.func @transform_4(%arg0: i32, %arg1: i32) -> (i32, i32) {
    %c0_i32 = arith.constant 0 : i32
    %c0_i32_0 = arith.constant 0 : i32
    %c0_i32_1 = arith.constant 0 : i32
    return %c0_i32, %c0_i32_0 : i32, i32
  }
  func.func @transform_5(%arg0: i32, %arg1: i32) -> (i32, i32) {
    %c0_i32 = arith.constant 0 : i32
    %c0_i32_0 = arith.constant 0 : i32
    %c0_i32_1 = arith.constant 0 : i32
    return %c0_i32, %c0_i32_0 : i32, i32
  }
  func.func @transform_6(%arg0: i32, %arg1: i32) -> (i32, i32) {
    %c1_i32 = arith.constant 1 : i32
    %0 = arith.muli %arg0, %c1_i32 : i32
    %1 = arith.addi %0, %arg1 : i32
    %c0_i32 = arith.constant 0 : i32
    %c0_i32_0 = arith.constant 0 : i32
    return %1, %c0_i32 : i32, i32
  }
  func.func @transform_7(%arg0: i32, %arg1: i32) -> (i32, i32) {
    %c0_i32 = arith.constant 0 : i32
    %c0_i32_0 = arith.constant 0 : i32
    %c0_i32_1 = arith.constant 0 : i32
    return %c0_i32, %c0_i32_0 : i32, i32
  }
  func.func @transform_8(%arg0: i32, %arg1: i32) -> (i32, i32, i32) {
    %c0_i32 = arith.constant 0 : i32
    %c0_i32_0 = arith.constant 0 : i32
    %c0_i32_1 = arith.constant 0 : i32
    return %arg0, %c0_i32, %c0_i32_0 : i32, i32, i32
  }
  func.func @transform_9(%arg0: i32, %arg1: i32) -> (i32, i32, i32) {
    %c0_i32 = arith.constant 0 : i32
    %c0_i32_0 = arith.constant 0 : i32
    %c0_i32_1 = arith.constant 0 : i32
    return %arg0, %c0_i32, %c0_i32_0 : i32, i32, i32
  }
  func.func @transform_10(%arg0: i32, %arg1: i32) -> (i32, i32, i32) {
    %c0_i32 = arith.constant 0 : i32
    %c0_i32_0 = arith.constant 0 : i32
    %c0_i32_1 = arith.constant 0 : i32
    return %arg0, %c0_i32, %c0_i32_0 : i32, i32, i32
  }
  func.func @transform_11(%arg0: i32, %arg1: i32) -> (i32, i32) {
    %c1_i32 = arith.constant 1 : i32
    %0 = arith.muli %arg0, %c1_i32 : i32
    %1 = arith.addi %0, %arg1 : i32
    %c0_i32 = arith.constant 0 : i32
    %c0_i32_0 = arith.constant 0 : i32
    return %1, %c0_i32 : i32, i32
  }
}

</mosaic_0001>

<bundles_post_ra>
// kernel: tpu_custom_call.1
= control target key start
LH: loop header
LB: loop body
LE: loop exit
PB: predicated region body
PF: predicated region fallthrough
CT: control target
= control target key end

     0   :  { %s4160_s0 = inlined_call_operand.vmem [shape: f32[16,256], index: 0, kind: input, shape index: {}]   ;;  %s4161_s1 = inlined_call_operand.hbm [shape: f32[40,256], index: 1, kind: input, shape index: {}]   ;;  %s4162_s2 = inlined_call_operand.vmem [shape: f32[1,40], index: 2, kind: input, shape index: {}]   ;;  %s4163_s3 = inlined_call_operand.vmem [shape: f32[1,40], index: 3, kind: input, shape index: {}]   ;;  %s4164_s4 = inlined_call_operand.vmem [shape: f32[40,8], index: 4, kind: input, shape index: {}]   ;;  %s4165_s5 = inlined_call_operand.vmem [shape: f32[8,40], index: 5, kind: input, shape index: {}]   ;;  %s4166_s6 = inlined_call_operand.vmem [shape: s32[16,1], index: 6, kind: input, shape index: {}]   ;;  %s4167_s7 = inlined_call_operand.<no memory space> [shape: f32[1,1], index: 7, kind: input, shape index: {}]   ;;  %s4168_s8 = inlined_call_operand.vmem [shape: f32[2,1,1], index: 8, kind: output, shape index: {0}]   ;;  %s4169_s9 = inlined_call_operand.hbm [shape: f32[2,40,256], index: 9, kind: output, shape index: {1}]   ;;  %s4170_s10 = inlined_call_operand.hbm [shape: f32[2,1,40], index: 10, kind: output, shape index: {2}]   ;;  %s4171_s11 = inlined_call_operand.vmem [shape: s32[16,1], index: 11, kind: output, shape index: {3}]  }
   0x1   :  { %4179 = sst [smem:[#allocation14_spill]] %s4160_s0 }
   0x2   :  { %4180 = sst [smem:[#allocation15_spill]] %s4161_s1 }
   0x3   :  { %4181 = sst [smem:[#allocation16_spill]] %s4162_s2 }
   0x4   :  { %17 = sst [smem:[#allocation2]] %s4167_s7 }
   0x5   :  { %18 = vsyncpa [#allocation4], 0 }
   0x6   :  { %19 = vsyncpa [#allocation5], 0 }
   0x7   :  { %21 = vsyncpa [#allocation5 + $0x1], 0 }
   0x8   :  { %22 = vsyncpa [#allocation8], 0 }
   0x9   :  { %24 = vsyncpa [#allocation8 + $0x1], 0  ;;  %s2999_s19 = smov 0   ;;  %s3001_s20 = smov 0  }
   0xa   :  { %s3003_s21 = smov 0   ;;  %s3005_s22 = smov 0  }
   0xb   :  { %s3007_s23 = smov 0   ;;  %s3009_s24 = smov 0  }
   0xc LB: > { %4182 = sst [smem:[#allocation12_spill]] %s2917_s23  ;;  %s2512_s7 = sadd.s32 4294967295, %s2921_s24   ;;  %s2921_s24 = sphi %s3009_s24, %s30_s24   ;;  %s2917_s23 = sphi %s3007_s23, %s4199_s23   ;;  %s2913_s22 = sphi %s3005_s22, %s4198_s22   ;;  %s2909_s21 = sphi %s3003_s21, %s4202_s21   ;;  %s2905_s20 = sphi %s3001_s20, %s4201_s20   ;;  %s2901_s19 = sphi %s2999_s19, %s4200_s19  }
   0xd   : > { %s2513_s25 = sadd.s32 4294967294, %s2921_s24   ;;  %s42_s26 = sadd.s32 1, %s2917_s23 }
   0xe   : > { %s257_s27 = sadd.s32 1, %s2909_s21  ;;  %p44_p0 = scmp.ge.s32.totalorder %s42_s26, 2 }
   0xf   : > { %p267_p1 = scmp.ne.s32.totalorder %s2909_s21, %s2905_s20  ;;  %p268_p2 = scmp.eq.s32.totalorder %s2512_s7, 1 }
  0x10   : > { %p273_p3 = scmp.ne.s32.totalorder %s2905_s20, %s2901_s19  ;;  %s4204_s26 = smov (%p44_p0, %s42_s26), 0 }
  0x11   : > { %4183 = sst [smem:[#allocation13_spill]] %s4204_s26  ;;  %p3039_p4 = por %p268_p2, %p267_p1 }
  0x12   : > { %p274_p5 = scmp.eq.s32.totalorder %s2513_s25, 1  ;;  %s254_s29 = ssub.s32 %s2917_s23, %s4204_s26 }
  0x13   : > { %s4184_s28 = scalar_select %p3039_p4, 1, 0 }
  0x14   : > { %p2514_p6 = scmp.ge.s32.totalorder %s2921_s24, 1  ;;  %p255_p7 = scmp.eq.s32.totalorder %s254_s29, 0 }
  0x15   : > { %p3046_p8 = por %p274_p5, %p273_p3  ;;  %p335_p9 = scmp.lt.s32.totalorder %s2921_s24, 3 }
  0x16   : > { %s3052_s12 = scalar_select %p255_p7, %s2909_s21, %s257_s27  }
  0x17   : > { %s4185_s30 = scalar_select %p3046_p8, 1, 0 }
  0x18   : > { %p3054_p10 = pnand %p2514_p6, %p335_p9  ;;  %p3058_p11 = scmp.eq.s32.totalorder %s2512_s7, 0 }
  0x19   : > { %s2923_s15 = smov [#allocation3]   ;;  %s4189_s1 = sld [smem:[#allocation15_spill]] }
  0x1a   : > { %s4186_s13 = scalar_select %p3054_p10, 1, 0 }
  0x1b   : > { %s4187_s14 = scalar_select %p3058_p11, 1, 0 }
  0x1c   : > { %p2596_p12 = pneg %p3054_p10  ;;  %s347_s16 = sshll.u32 %s2923_s15, 4  ;;  %s348_s16 = int_to_ptr.vmem [resolvable:$true] %s347_s16 }
  0x1e   : > { %p3066_p13 = pnand %p3058_p11, %p2596_p12 }
  0x1f   : > { %s2779_s27 = scalar_lea.hbm %s4189_s1, 1280 }
  0x20   : > { %p2780_p0 = scmp.ne.s32.totalorder %s4189_s1, %s2779_s27  ;;  %p2781_p1 = pneg %p3066_p13 }
  0x21   : > { %p2786_p5 = scmp.lt.u32.totalorder %s2779_s27, %s4189_s1 }
  0x22   : > { %p2782_p2 = pnand %p2781_p1, %p2780_p0 }
  0x24   : > { %p2783_p3 = pneg %p2782_p2 }
  0x26   : > { %p2788_p6 = pnand %p2786_p5, %p2783_p3 }
  0x28   : > { %2791 = shalt.err (!%p2788_p6)
}
  0x29   : > { %s2792_s23 = scalar_lea.vmem %s348_s16, 1280  ;;  %p2800_p8 = scmp.lt.s32.totalorder %s348_s16, %s348_s16 }
  0x2a   : > { %p2793_p7 = scmp.ne.s32.totalorder %s348_s16, %s2792_s23  ;;  %p2801_p4 = scmp.lt.s32.totalorder %s2792_s23, %s2792_s23 }
  0x2c   : > { %p2795_p9 = pnand %p2793_p7, %p2781_p1  ;;  %p2802_p11 = por %p2801_p4, %p2800_p8 }
  0x2e   : > { %p2796_p12 = pneg %p2795_p9 }
  0x30   : > { %p2803_p10 = pnand %p2802_p11, %p2796_p12 }
  0x32   : > { %2806 = shalt.err (!%p2803_p10)
}
  0x33   : > { %s2924_s18 = smov 256   ;;  %s2925_s25 = smov 16  }
  0x34   : > { %2599 = dma.hbm_to_vmem [thread:$0]  (!%p3066_p13), %s4189_s1, 1280, %s348_s16, [#allocation4], %s2924_s18, %s2924_s18, %s2925_s25  }
  0x35   : > { %p4190_p0 = scmp.ne.s32.totalorder %s4186_s13, 0 }
  0x36   : > { %p4191_p2 = scmp.ne.s32.totalorder (!%p4190_p0), %s4187_s14, 0 }
  0x37   : > { %397 = sbr.rel (%p4190_p0) target bundleno = 1237 (0x4d5), region = 52 }
  0x3e   : > { %2888 = dma.done.wait (%p4191_p2), [#allocation4], 1280  }
  0x3f   : > { %2890 = vsyncadd (%p4191_p2), [#allocation4], 4294966016  ;;  %p456_p4 = scmp.lt.s32.totalorder %s2913_s22, 1  ;;  %v502_v0 = vlaneseq  ;;  %v2926_v1 = vmov 1966171168   ;;  %v3100_v5 = vld [vmem:[#allocation3 + $0x8] sm:$0xff] }
  0x40   : > { %v500_v2 = vunpack.c.l.s4 %v2926_v1  ;;  %v3102_v6 = vld [vmem:[#allocation3 + $0x18] sm:$0xff]  ;;  %v3104_v7 = vld [vmem:[#allocation3] sm:$0xff]  ;;  %s4192_s0 = sld [smem:[#allocation14_spill]]  ;;  %v3114_v10 = vld [vmem:[#allocation3 + $0x10] sm:$0xff]  ;;  %s4193_s2 = sld [smem:[#allocation16_spill]] }
  0x41   : > { %s3094_s23 = scalar_select %p456_p4, %s2913_s22, 1  ;;  %v3097_v4 = vshrl.u32 %v502_v0, 7  ;;  %v2572_v9 = vpack.c.bf16 %v3102_v6, %v3100_v5  ;;  %v3116_v11 = vld [vmem:[#allocation3 + $0x28] sm:$0xff]  ;;  %v3118_v12 = vld [vmem:[#allocation3 + $0x38] sm:$0xff]  ;;  %v2574_v13 = vpack.c.bf16 %v3114_v10, %v3104_v7  ;;  %v3130_v20 = vld [vmem:[#allocation3 + $0x20] sm:$0xff] }
  0x42   : > { %v501_v3 = vunpack.c.0.s8 %v500_v2  ;;  %v2576_v14 = vpack.c.bf16 %v3118_v12, %v3116_v11  ;;  %v3132_v21 = vld [vmem:[#allocation3 + $0x30] sm:$0xff]  ;;  %v3142_v36 = vld [vmem:[#allocation3 + $0x48] sm:$0xff]  ;;  %v3184_v61 = vld [vmem:[#allocation3 + $0x40] sm:$0xff]  ;;  %s1302_s13 = sld [smem:[#allocation2]]  ;;  %s4037_s29 = sand.u32 1, %s2905_s20  }
  0x43   : > { %s2538_s26 = sshll.u32 %s3094_s23, 4  ;;  %2573 = vmatprep.subr.bf16.mxu0 %v2572_v9  ;;  %v3138_v27 = vsub.s32 0, %v3097_v4  ;;  %v2578_v30 = vpack.c.bf16 %v3132_v21, %v3130_v20  ;;  %s4178_s17 = sshll.u32 %s3094_s23, 3 }
  0x44   : > { %v504_v8 = vsub.s32 %v501_v3, %v3097_v4  ;;  %2575 = vmatpush1.bf16.xpose.msra.mxu0 %v2574_v13  ;;  %s466_s18 = scalar_lea.vmem %s4166_s6, %s4178_s17  ;;  %s4031_s7 = scalar_lea.vmem %s4168_s8, %s3094_s23 }
  0x45   : > { %2577 = vmatprep.subr.bf16.mxu0 %v2576_v14  ;;  %s2305_s17 = scalar_lea.sflag [#allocation8], %s4037_s29  ;;  %p4194_p10 = scmp.ne.s32.totalorder %s4184_s28, 0 }
  0x46   : > { %s3109_s16 = scalar_lea.vmem %s4192_s0, %s2538_s26  ;;  %s4040_s26 = scalar_lea.vmem [#allocation7], %s4037_s29 }
  0x47   : > { %v496_v15 = vld [vmem:[%s3109_s16 + $0x8] sm:$0xff]  ;;  %v3126_v16 = vld [vmem:[%s3109_s16] sm:$0xff]  ;;  %s2341_s15 = sshll.u32 %s4040_s26, 4  ;;  %s4067_s15 = int_to_ptr.vmem [resolvable:$true] %s2341_s15 }
  0x48   : > { %v588_v17 = vcombine.high %v496_v15, %v496_v15  ;;  %v595_v18 = vrot.slane %v496_v15, %v504_v8  ;;  %1859 = vmatprep.mubr.f32.mxu0 %v496_v15  ;;  %v498_v19 = vcombine.high %v3126_v16, %v3126_v16  ;;  %v505_v22 = vrot.slane %v3126_v16, %v504_v8  ;;  %s1303_s14 = ssub.f32 0.0, %s1302_s13  ;;  %s2586_s13 = smul.u32 80, %s4037_s29 }
  0x49   : > { %v1865_v23 = vmul.f32 %v3126_v16, %v3126_v16  ;;  %v1866_v24 = vmul.f32 %v496_v15, %v496_v15 }
  0x4a   : > { %v602_v25 = vrot.slane %v588_v17, %v504_v8  ;;  %v603_v26 = vcombine.high %v595_v18, %v595_v18  ;;  %v513_v28 = vcombine.high %v505_v22, %v505_v22  ;;  %v611_v32 = vrot.slane %v595_v18, %v504_v8  ;;  %s1306_s27 = smul.f32 0.0015625, %s1303_s14  ;;  %s4050_s14 = scalar_lea.vmem [#allocation6], %s2586_s13 }
  0x4b   : > { %v1867_v29 = vadd.f32 %v1866_v24, %v1865_v23  ;;  %v512_v33 = vrot.slane %v498_v19, %v504_v8  ;;  %v521_v35 = vrot.slane %v505_v22, %v504_v8 }
  0x4c   : > { %v604_v31 = vcombine.high %v602_v25, %v602_v25  ;;  %v625_v34 = vrot.slane %v603_v26, %v504_v8  ;;  %v618_v37 = vrot.slane %v602_v25, %v504_v8  ;;  %v633_v38 = vcombine.high %v611_v32, %v611_v32  ;;  %2579 = vmatpush1.bf16.xpose.msra.mxu0 %v2578_v30 }
  0x4d   : > { %1868 = vadd.xlane.f32.xlu0 %v1867_v29  ;;  %v514_v39 = vcombine.high %v512_v33, %v512_v33  ;;  %v535_v40 = vrot.slane %v513_v28, %v504_v8  ;;  %v543_v43 = vcombine.high %v521_v35, %v521_v35  ;;  %v3145_v44 = vrot.slane %v611_v32, %v3138_v27 }
  0x4e   : > { %v632_v41 = vrot.slane %v604_v31, %v504_v8  ;;  %v635_v42 = vcombine.high %v625_v34, %v625_v34  ;;  %1803 = vmatprep.subr.mxu0 %v3142_v36  ;;  %v634_v45 = vcombine.high %v618_v37, %v618_v37  ;;  %v3149_v46 = vrot.slane %v625_v34, %v3138_v27 }
  0x4f   : > { %v3151_v47 = vrot.slane %v512_v33, %v504_v8  ;;  %v3154_v48 = vrot.slane %v521_v35, %v3138_v27  ;;  %v3157_v49 = vrot.slane %v633_v38, %v3138_v27  ;;  %v3160_v50 = vrot.slane %v618_v37, %v3138_v27 }
  0x50   : > { %v3162_v51 = vrot.slane %v514_v39, %v504_v8  ;;  %v3165_v52 = vrot.slane %v535_v40, %v3138_v27  ;;  %v636_v53 = vcombine.high %v632_v41, %v632_v41  ;;  %v3168_v54 = vrot.slane %v635_v42, %v3138_v27 }
  0x51   : > { %v3171_v55 = vrot.slane %v632_v41, %v3138_v27  ;;  %v3174_v56 = vrot.slane %v543_v43, %v3138_v27  ;;  %v807_v57 = vsub.f32 %v3154_v48, %v3114_v10  ;;  %v815_v58 = vsub.f32 %v3145_v44, %v3102_v6 }
  0x52   : > { %v682_v59 = vsub.f32 %v3154_v48, %v3104_v7  ;;  %v690_v60 = vsub.f32 %v3145_v44, %v3100_v5  ;;  %v932_v62 = vsub.f32 %v3154_v48, %v3130_v20  ;;  %v940_v63 = vsub.f32 %v3145_v44, %v3116_v11 }
  0x53   : > { %v808_v1 = vsub.f32 %v3165_v52, %v3114_v10  ;;  %v816_v2 = vsub.f32 %v3149_v46, %v3102_v6  ;;  %v823_v3 = vmul.f32 %v807_v57, %v807_v57  ;;  %v831_v8 = vmul.f32 %v815_v58, %v815_v58 }
  0x54   : > { %v698_v9 = vmul.f32 %v682_v59, %v682_v59  ;;  %v706_v13 = vmul.f32 %v690_v60, %v690_v60  ;;  %v948_v14 = vmul.f32 %v932_v62, %v932_v62  ;;  %v956_v15 = vmul.f32 %v940_v63, %v940_v63  ;;  %1804 = vmatpush1.xpose.msra.mxu0 %v3184_v61 }
  0x55   : > { %v824_v17 = vmul.f32 %v808_v1, %v808_v1  ;;  %v832_v18 = vmul.f32 %v816_v2, %v816_v2  ;;  %v3196_v19 = vrot.slane %v634_v45, %v3138_v27  ;;  %v545_v22 = vcombine.high %v535_v40, %v535_v40 }
  0x56   : > { %v3198_v23 = vadd.f32 %v831_v8, %v823_v3  ;;  %v3200_v24 = vadd.f32 %v706_v13, %v698_v9  ;;  %v544_v25 = vcombine.high %v3151_v47, %v3151_v47  ;;  %v3204_v26 = vadd.f32 %v956_v15, %v948_v14 }
  0x57   : > { %v3206_v28 = vadd.f32 %v832_v18, %v824_v17  ;;  %v1057_v29 = vsub.f32 %v3154_v48, %v3132_v21  ;;  %v1065_v30 = vsub.f32 %v3145_v44, %v3118_v12  ;;  %v809_v31 = vsub.f32 %v3174_v56, %v3114_v10  ;;  %1860 = vmatmul.mubr.f32.vlgmr.msra.gmra.mrb[0].mxu0 %v3126_v16 }
  0x58   : > { %2673 = vrsqrt.f32 %v3198_v23  ;;  %v817_v32 = vsub.f32 %v3157_v49, %v3102_v6  ;;  %v3218_v33 = vrot.slane %v636_v53, %v3138_v27  ;;  %v546_v34 = vcombine.high %v3162_v51, %v3162_v51 }
  0x59   : > { %v3224_v35 = vrot.slane %v3151_v47, %v3138_v27  ;;  %2675 = vrsqrt.f32 %v3200_v24  ;;  %v3229_v37 = vrot.slane %v545_v22, %v3138_v27  ;;  %v3233_v38 = vrot.slane %v3162_v51, %v3138_v27 }
  0x5a   : > { %vm849_vm0 = vcmp.eq.f32.partialorder %v3198_v23, inf  ;;  %2677 = vrsqrt.f32 %v3204_v26  ;;  %vm851_vm1 = vcmp.eq.f32.partialorder %v3198_v23, 0.0  ;;  %v852_v39 = vand.u32 2147483648, %v3198_v23 }
  0x5b   : > { %vm724_vm2 = vcmp.eq.f32.partialorder %v3200_v24, inf  ;;  %2679 = vrsqrt.f32 %v3206_v28  ;;  %vm726_vm3 = vcmp.eq.f32.partialorder %v3200_v24, 0.0  ;;  %v1073_v16 = vmul.f32 %v1057_v29, %v1057_v29 }
  0x5c   : > { %v1081_v40 = vmul.f32 %v1065_v30, %v1065_v30  ;;  %v825_v41 = vmul.f32 %v809_v31, %v809_v31  ;;  %v833_v42 = vmul.f32 %v817_v32, %v817_v32  ;;  %v683_v43 = vsub.f32 %v3165_v52, %v3104_v7 }
  0x5d   : > { %v691_v45 = vsub.f32 %v3149_v46, %v3100_v5  ;;  %v933_v53 = vsub.f32 %v3165_v52, %v3130_v20  ;;  %v941_v57 = vsub.f32 %v3149_v46, %v3116_v11  ;;  %v727_v58 = vand.u32 2147483648, %v3200_v24 }
  0x5e   : > { %v3251_v59 = vadd.f32 %v1081_v40, %v1073_v16  ;;  %v3253_v60 = vadd.f32 %v833_v42, %v825_v41  ;;  %v684_v62 = vsub.f32 %v3174_v56, %v3104_v7  ;;  %v699_v63 = vmul.f32 %v683_v43, %v683_v43 }
  0x5f   : > { %v707_v1 = vmul.f32 %v691_v45, %v691_v45  ;;  %v949_v2 = vmul.f32 %v933_v53, %v933_v53  ;;  %v957_v3 = vmul.f32 %v941_v57, %v941_v57  ;;  %vm974_vm4 = vcmp.eq.f32.partialorder %v3204_v26, inf }
  0x60   : > { %vm976_vm5 = vcmp.eq.f32.partialorder %v3204_v26, 0.0  ;;  %2681 = vrsqrt.f32 %v3251_v59  ;;  %v692_v8 = vsub.f32 %v3157_v49, %v3100_v5  ;;  %v977_v9 = vand.u32 2147483648, %v3204_v26 }
  0x61   : > { %vm856_vm6 = vcmp.eq.f32.partialorder %v3206_v28, inf  ;;  %vm858_vm7 = vcmp.eq.f32.partialorder %v3206_v28, 0.0  ;;  %2683 = vrsqrt.f32 %v3253_v60  ;;  %v859_v14 = vand.u32 2147483648, %v3206_v28 }
  0x62   : > { %v2674_v13 = vpop.eup %2673  ;;  %vm1099_vm8 = vcmp.eq.f32.partialorder %v3251_v59, inf  ;;  %v3268_v15 = vadd.f32 %v707_v1, %v699_v63  ;;  %v3270_v17 = vadd.f32 %v957_v3, %v949_v2  ;;  %vm1101_vm9 = vcmp.eq.f32.partialorder %v3251_v59, 0.0 }
  0x63   : > { %v2676_v18 = vpop.eup %2675  ;;  %v848_v22 = vmul.f32 %v2674_v13, %v3198_v23  ;;  %v1102_v29 = vand.u32 2147483648, %v3251_v59  ;;  %v700_v30 = vmul.f32 %v684_v62, %v684_v62  ;;  %v708_v16 = vmul.f32 %v692_v8, %v692_v8 }
  0x64   : > { %v2678_v31 = vpop.eup %2677  ;;  %v723_v32 = vmul.f32 %v2676_v18, %v3200_v24  ;;  %2685 = vrsqrt.f32 %v3268_v15  ;;  %v811_v40 = vsub.f32 %v3224_v35, %v3114_v10  ;;  %v819_v45 = vsub.f32 %v3160_v50, %v3102_v6 }
  0x65   : > { %v2680_v41 = vpop.eup %2679  ;;  %v850_v42 = vsel %vm849_vm0, %v3198_v23, %v848_v22  ;;  %v973_v43 = vmul.f32 %v2678_v31, %v3204_v26  ;;  %2687 = vrsqrt.f32 %v3270_v17  ;;  %v686_v63 = vsub.f32 %v3224_v35, %v3104_v7 }
  0x66   : > { %v853_v53 = vsel %vm851_vm1, %v852_v39, %v850_v42  ;;  %v725_v57 = vsel %vm724_vm2, %v3200_v24, %v723_v32  ;;  %v855_v62 = vmul.f32 %v2680_v41, %v3206_v28  ;;  %vm863_vm10 = vcmp.eq.f32.partialorder %v3253_v60, inf }
  0x67   : > { %903 = vadd.xlane.f32.xlu1 %v853_v53  ;;  %v728_v1 = vsel %vm726_vm3, %v727_v58, %v725_v57  ;;  %v975_v2 = vsel %vm974_vm4, %v3204_v26, %v973_v43  ;;  %vm865_vm11 = vcmp.eq.f32.partialorder %v3253_v60, 0.0  ;;  %v3306_v3 = vadd.f32 %v708_v16, %v700_v30 }
  0x68   : > { %778 = vadd.xlane.f32.xlu0 %v728_v1  ;;  %v978_v23 = vsel %vm976_vm5, %v977_v9, %v975_v2  ;;  %v857_v39 = vsel %vm856_vm6, %v3206_v28, %v855_v62  ;;  %v827_v24 = vmul.f32 %v811_v40, %v811_v40  ;;  %v866_v8 = vand.u32 2147483648, %v3253_v60 }
  0x69   : > { %v860_v58 = vsel %vm858_vm7, %v859_v14, %v857_v39  ;;  %v835_v13 = vmul.f32 %v819_v45, %v819_v45  ;;  %v694_v18 = vsub.f32 %v3160_v50, %v3100_v5  ;;  %vm731_vm12 = vcmp.eq.f32.partialorder %v3268_v15, inf }
  0x6a   : > { %v2682_v22 = vpop.eup %2681  ;;  %vm733_vm13 = vcmp.eq.f32.partialorder %v3268_v15, 0.0  ;;  %2689 = vrsqrt.f32 %v3306_v3  ;;  %v702_v26 = vmul.f32 %v686_v63, %v686_v63  ;;  %v1058_v31 = vsub.f32 %v3165_v52, %v3132_v21 }
  0x6b   : > { %v2684_v9 = vpop.eup %2683  ;;  %1028 = vadd.xlane.f32.xlu1 %v978_v23  ;;  %v1098_v30 = vmul.f32 %v2682_v22, %v3251_v59  ;;  %v3317_v28 = vadd.f32 %v835_v13, %v827_v24  ;;  %v710_v14 = vmul.f32 %v694_v18, %v694_v18  ;;  %v734_v16 = vand.u32 2147483648, %v3268_v15 }
  0x6c   : > { %905 = vadd.xlane.f32.xlu0 %v860_v58  ;;  %v862_v32 = vmul.f32 %v2684_v9, %v3253_v60  ;;  %vm981_vm14 = vcmp.eq.f32.partialorder %v3270_v17, inf  ;;  %v1066_v40 = vsub.f32 %v3149_v46, %v3118_v12  ;;  %v984_v42 = vand.u32 2147483648, %v3270_v17 }
  0x6d   : > { %v1100_v41 = vsel %vm1099_vm8, %v3251_v59, %v1098_v30  ;;  %2691 = vrsqrt.f32 %v3317_v28  ;;  %v934_v43 = vsub.f32 %v3174_v56, %v3130_v20  ;;  %v3338_v62 = vadd.f32 %v710_v14, %v702_v26 }
  0x6e   : > { %v2686_v45 = vpop.eup %2685  ;;  %v1103_v53 = vsel %vm1101_vm9, %v1102_v29, %v1100_v41  ;;  %v864_v57 = vsel %vm863_vm10, %v3253_v60, %v862_v32  ;;  %v942_v63 = vsub.f32 %v3157_v49, %v3116_v11  ;;  %v1074_v39 = vmul.f32 %v1058_v31, %v1058_v31 }
  0x6f   : > { %v2688_v1 = vpop.eup %2687  ;;  %1153 = vadd.xlane.f32.xlu1 %v1103_v53  ;;  %v867_v2 = vsel %vm865_vm11, %v866_v8, %v864_v57  ;;  %v730_v23 = vmul.f32 %v2686_v45, %v3268_v15  ;;  %v1082_v24 = vmul.f32 %v1066_v40, %v1066_v40  ;;  %v3349_v59 = vrot.slane %v544_v25, %v3138_v27 }
  0x70   : > { %907 = vadd.xlane.f32.xlu0 %v867_v2  ;;  %v980_v29 = vmul.f32 %v2688_v1, %v3270_v17  ;;  %vm983_vm15 = vcmp.eq.f32.partialorder %v3270_v17, 0.0  ;;  %2693 = vrsqrt.f32 %v3338_v62  ;;  %v3358_v60 = vrot.slane %v546_v34, %v3138_v27 }
  0x71   : > { %v732_v58 = vsel %vm731_vm12, %v3268_v15, %v730_v23  ;;  %v3363_v47 = vadd.f32 %v1082_v24, %v1074_v39  ;;  %v950_v25 = vmul.f32 %v934_v43, %v934_v43  ;;  %v958_v18 = vmul.f32 %v942_v63, %v942_v63 }
  0x72   : > { %v735_v8 = vsel %vm733_vm13, %v734_v16, %v732_v58  ;;  %v982_v13 = vsel %vm981_vm14, %v3270_v17, %v980_v29  ;;  %v810_v51 = vsub.f32 %v3229_v37, %v3114_v10  ;;  %vm738_vm0 = vcmp.eq.f32.partialorder %v3306_v3, inf }
  0x73   : > { %780 = vadd.xlane.f32.xlu1 %v735_v8  ;;  %v985_v34 = vsel %vm983_vm15, %v984_v42, %v982_v13  ;;  %vm740_vm1 = vcmp.eq.f32.partialorder %v3306_v3, 0.0  ;;  %2695 = vrsqrt.f32 %v3363_v47  ;;  %v741_v15 = vand.u32 2147483648, %v3306_v3 }
  0x74   : > { %v2690_v22 = vpop.eup %2689  ;;  %1030 = vadd.xlane.f32.xlu0 %v985_v34  ;;  %v3376_v26 = vadd.f32 %v958_v18, %v950_v25  ;;  %v818_v17 = vsub.f32 %v3168_v54, %v3102_v6  ;;  %v826_v9 = vmul.f32 %v810_v51, %v810_v51  ;;  %v685_v14 = vsub.f32 %v3229_v37, %v3104_v7 }
  0x75   : > { %v737_v30 = vmul.f32 %v2690_v22, %v3306_v3  ;;  %v693_v31 = vsub.f32 %v3168_v54, %v3100_v5  ;;  %v687_v32 = vsub.f32 %v3233_v38, %v3104_v7  ;;  %vm877_vm2 = vcmp.eq.f32.partialorder %v3317_v28, inf }
  0x76   : > { %vm879_vm3 = vcmp.eq.f32.partialorder %v3317_v28, 0.0  ;;  %v880_v16 = vand.u32 2147483648, %v3317_v28  ;;  %2697 = vrsqrt.f32 %v3376_v26  ;;  %v834_v42 = vmul.f32 %v818_v17, %v818_v17 }
  0x77   : > { %v2692_v40 = vpop.eup %2691  ;;  %v739_v41 = vsel %vm738_vm0, %v3306_v3, %v737_v30  ;;  %v701_v43 = vmul.f32 %v685_v14, %v685_v14  ;;  %v709_v45 = vmul.f32 %v693_v31, %v693_v31  ;;  %vm752_vm4 = vcmp.eq.f32.partialorder %v3338_v62, inf }
  0x78   : > { %v742_v53 = vsel %vm740_vm1, %v741_v15, %v739_v41  ;;  %v876_v57 = vmul.f32 %v2692_v40, %v3317_v28  ;;  %v695_v63 = vsub.f32 %v3171_v55, %v3100_v5  ;;  %v755_v1 = vand.u32 2147483648, %v3338_v62 }
  0x79   : > { %782 = vadd.xlane.f32.xlu1 %v742_v53  ;;  %v3401_v2 = vadd.f32 %v834_v42, %v826_v9  ;;  %v3403_v23 = vadd.f32 %v709_v45, %v701_v43  ;;  %v703_v39 = vmul.f32 %v687_v32, %v687_v32  ;;  %v812_v58 = vsub.f32 %v3233_v38, %v3114_v10 }
  0x7a   : > { %v2694_v24 = vpop.eup %2693  ;;  %v878_v3 = vsel %vm877_vm2, %v3317_v28, %v876_v57  ;;  %v711_v29 = vmul.f32 %v695_v63, %v695_v63  ;;  %v820_v25 = vsub.f32 %v3171_v55, %v3102_v6  ;;  %vm754_vm5 = vcmp.eq.f32.partialorder %v3338_v62, 0.0 }
  0x7b   : > { %v881_v8 = vsel %vm879_vm3, %v880_v16, %v878_v3  ;;  %v751_v13 = vmul.f32 %v2694_v24, %v3338_v62  ;;  %2699 = vrsqrt.f32 %v3401_v2  ;;  %vm1106_vm6 = vcmp.eq.f32.partialorder %v3363_v47, inf }
  0x7c   : > { %911 = vadd.xlane.f32.xlu0 %v881_v8  ;;  %2701 = vrsqrt.f32 %v3403_v23  ;;  %v935_v18 = vsub.f32 %v3229_v37, %v3130_v20  ;;  %v943_v51 = vsub.f32 %v3168_v54, %v3116_v11  ;;  %vm1108_vm7 = vcmp.eq.f32.partialorder %v3363_v47, 0.0 }
  0x7d   : > { %v2696_v34 = vpop.eup %2695  ;;  %v753_v28 = vsel %vm752_vm4, %v3338_v62, %v751_v13  ;;  %v1109_v22 = vand.u32 2147483648, %v3363_v47  ;;  %v3428_v15 = vadd.f32 %v711_v29, %v703_v39  ;;  %v828_v30 = vmul.f32 %v812_v58, %v812_v58 }
  0x7e   : > { %v756_v17 = vsel %vm754_vm5, %v755_v1, %v753_v28  ;;  %v1105_v9 = vmul.f32 %v2696_v34, %v3363_v47  ;;  %v836_v14 = vmul.f32 %v820_v25, %v820_v25  ;;  %vm988_vm8 = vcmp.eq.f32.partialorder %v3376_v26, inf }
  0x7f   : > { %786 = vadd.xlane.f32.xlu1 %v756_v17  ;;  %vm990_vm9 = vcmp.eq.f32.partialorder %v3376_v26, 0.0  ;;  %v991_v31 = vand.u32 2147483648, %v3376_v26  ;;  %2703 = vrsqrt.f32 %v3428_v15  ;;  %v951_v40 = vmul.f32 %v935_v18, %v935_v18 }
  0x80   : > { %v2698_v62 = vpop.eup %2697  ;;  %v1107_v32 = vsel %vm1106_vm6, %v3363_v47, %v1105_v9  ;;  %v3438_v16 = vadd.f32 %v836_v14, %v828_v30  ;;  %v959_v41 = vmul.f32 %v943_v51, %v943_v51  ;;  %v688_v45 = vsub.f32 %v3349_v59, %v3104_v7 }
  0x81   : > { %v1110_v42 = vsel %vm1108_vm7, %v1109_v22, %v1107_v32  ;;  %v987_v43 = vmul.f32 %v2698_v62, %v3376_v26  ;;  %v696_v53 = vsub.f32 %v3196_v19, %v3100_v5  ;;  %vm870_vm10 = vcmp.eq.f32.partialorder %v3401_v2, inf }
  0x82   : > { %1155 = vadd.xlane.f32.xlu0 %v1110_v42  ;;  %vm872_vm11 = vcmp.eq.f32.partialorder %v3401_v2, 0.0  ;;  %v873_v57 = vand.u32 2147483648, %v3401_v2  ;;  %2705 = vrsqrt.f32 %v3438_v16  ;;  %v3454_v63 = vadd.f32 %v959_v41, %v951_v40 }
  0x83   : > { %v989_v47 = vsel %vm988_vm8, %v3376_v26, %v987_v43  ;;  %v704_v1 = vmul.f32 %v688_v45, %v688_v45  ;;  %v712_v39 = vmul.f32 %v696_v53, %v696_v53  ;;  %v813_v3 = vsub.f32 %v3349_v59, %v3114_v10 }
  0x84   : > { %v992_v24 = vsel %vm990_vm9, %v991_v31, %v989_v47  ;;  %v821_v29 = vsub.f32 %v3196_v19, %v3102_v6  ;;  %v936_v58 = vsub.f32 %v3224_v35, %v3130_v20  ;;  %vm745_vm12 = vcmp.eq.f32.partialorder %v3403_v23, inf }
  0x85   : > { %v2700_v25 = vpop.eup %2699  ;;  %1032 = vadd.xlane.f32.xlu1 %v992_v24  ;;  %vm747_vm13 = vcmp.eq.f32.partialorder %v3403_v23, 0.0  ;;  %v748_v8 = vand.u32 2147483648, %v3403_v23  ;;  %2707 = vrsqrt.f32 %v3454_v63  ;;  %v3469_v18 = vadd.f32 %v712_v39, %v704_v1 }
  0x86   : > { %v2702_v26 = vpop.eup %2701  ;;  %v869_v13 = vmul.f32 %v2700_v25, %v3401_v2  ;;  %v829_v51 = vmul.f32 %v813_v3, %v813_v3  ;;  %v837_v34 = vmul.f32 %v821_v29, %v821_v29  ;;  %vm759_vm14 = vcmp.eq.f32.partialorder %v3428_v15, inf }
  0x87   : > { %v744_v28 = vmul.f32 %v2702_v26, %v3403_v23  ;;  %vm761_vm15 = vcmp.eq.f32.partialorder %v3428_v15, 0.0  ;;  %v944_v22 = vsub.f32 %v3160_v50, %v3116_v11  ;;  %2709 = vrsqrt.f32 %v3469_v18 }
  0x88   : > { %v871_v17 = vsel %vm870_vm10, %v3401_v2, %v869_v13  ;;  %v952_v9 = vmul.f32 %v936_v58, %v936_v58  ;;  %v1059_v30 = vsub.f32 %v3174_v56, %v3132_v21  ;;  %v762_v32 = vand.u32 2147483648, %v3428_v15 }
  0x89   : > { %v2704_v14 = vpop.eup %2703  ;;  %v874_v31 = vsel %vm872_vm11, %v873_v57, %v871_v17  ;;  %v746_v62 = vsel %vm745_vm12, %v3403_v23, %v744_v28  ;;  %v3488_v40 = vadd.f32 %v837_v34, %v829_v51  ;;  %v960_v43 = vmul.f32 %v944_v22, %v944_v22 }
  0x8a   : > { %909 = vadd.xlane.f32.xlu0 %v874_v31  ;;  %v749_v41 = vsel %vm747_vm13, %v748_v8, %v746_v62  ;;  %v758_v42 = vmul.f32 %v2704_v14, %v3428_v15  ;;  %v1067_v45 = vsub.f32 %v3157_v49, %v3118_v12  ;;  %vm884_vm0 = vcmp.eq.f32.partialorder %v3438_v16, inf }
  0x8b   : > { %784 = vadd.xlane.f32.xlu1 %v749_v41  ;;  %vm886_vm1 = vcmp.eq.f32.partialorder %v3438_v16, 0.0  ;;  %v887_v2 = vand.u32 2147483648, %v3438_v16  ;;  %2711 = vrsqrt.f32 %v3488_v40  ;;  %v3502_v57 = vadd.f32 %v960_v43, %v952_v9 }
  0x8c   : > { %v2706_v53 = vpop.eup %2705  ;;  %v760_v23 = vsel %vm759_vm14, %v3428_v15, %v758_v42  ;;  %v1075_v47 = vmul.f32 %v1059_v30, %v1059_v30  ;;  %v1083_v1 = vmul.f32 %v1067_v45, %v1067_v45  ;;  %v689_v3 = vsub.f32 %v3358_v60, %v3104_v7 }
  0x8d   : > { %v763_v39 = vsel %vm761_vm15, %v762_v32, %v760_v23  ;;  %v883_v24 = vmul.f32 %v2706_v53, %v3438_v16  ;;  %v697_v29 = vsub.f32 %v3218_v33, %v3100_v5  ;;  %vm995_vm2 = vcmp.eq.f32.partialorder %v3454_v63, inf }
  0x8e   : > { %788 = vadd.xlane.f32.xlu0 %v763_v39  ;;  %vm997_vm3 = vcmp.eq.f32.partialorder %v3454_v63, 0.0  ;;  %v998_v58 = vand.u32 2147483648, %v3454_v63  ;;  %2713 = vrsqrt.f32 %v3502_v57  ;;  %v3518_v8 = vadd.f32 %v1083_v1, %v1075_v47 }
  0x8f   : > { %v2708_v25 = vpop.eup %2707  ;;  %v885_v15 = vsel %vm884_vm0, %v3438_v16, %v883_v24  ;;  %v705_v7 = vmul.f32 %v689_v3, %v689_v3  ;;  %v713_v26 = vmul.f32 %v697_v29, %v697_v29  ;;  %v814_v51 = vsub.f32 %v3358_v60, %v3114_v10 }
  0x90   : > { %v888_v5 = vsel %vm886_vm1, %v887_v2, %v885_v15  ;;  %v994_v13 = vmul.f32 %v2708_v25, %v3454_v63  ;;  %v822_v34 = vsub.f32 %v3218_v33, %v3102_v6  ;;  %vm766_vm4 = vcmp.eq.f32.partialorder %v3469_v18, inf }
  0x91   : > { %913 = vadd.xlane.f32.xlu1 %v888_v5  ;;  %vm768_vm5 = vcmp.eq.f32.partialorder %v3469_v18, 0.0  ;;  %v769_v28 = vand.u32 2147483648, %v3469_v18  ;;  %2715 = vrsqrt.f32 %v3518_v8  ;;  %v2710_v22 = vpop.eup %2709  ;;  %v3534_v17 = vadd.f32 %v713_v26, %v705_v7 }
  0x92   : > { %v996_v16 = vsel %vm995_vm2, %v3454_v63, %v994_v13  ;;  %v830_v10 = vmul.f32 %v814_v51, %v814_v51  ;;  %v838_v9 = vmul.f32 %v822_v34, %v822_v34  ;;  %v765_v30 = vmul.f32 %v2710_v22, %v3469_v18 }
  0x93   : > { %v999_v6 = vsel %vm997_vm3, %v998_v58, %v996_v16  ;;  %v937_v14 = vsub.f32 %v3233_v38, %v3130_v20  ;;  %v945_v31 = vsub.f32 %v3171_v55, %v3116_v11  ;;  %vm891_vm6 = vcmp.eq.f32.partialorder %v3488_v40, inf }
  0x94   : > { %1034 = vadd.xlane.f32.xlu0 %v999_v6  ;;  %vm893_vm7 = vcmp.eq.f32.partialorder %v3488_v40, 0.0  ;;  %v894_v62 = vand.u32 2147483648, %v3488_v40  ;;  %2717 = vrsqrt.f32 %v3534_v17  ;;  %v767_v63 = vsel %vm766_vm4, %v3469_v18, %v765_v30 }
  0x95   : > { %v2712_v32 = vpop.eup %2711  ;;  %v3550_v41 = vadd.f32 %v838_v9, %v830_v10  ;;  %v953_v42 = vmul.f32 %v937_v14, %v937_v14  ;;  %v961_v43 = vmul.f32 %v945_v31, %v945_v31  ;;  %v770_v45 = vsel %vm768_vm5, %v769_v28, %v767_v63 }
  0x96   : > { %v890_v2 = vmul.f32 %v2712_v32, %v3488_v40  ;;  %v1060_v53 = vsub.f32 %v3229_v37, %v3132_v21  ;;  %v1068_v23 = vsub.f32 %v3168_v54, %v3118_v12  ;;  %790 = vadd.xlane.f32.xlu1 %v770_v45  ;;  %vm1002_vm8 = vcmp.eq.f32.partialorder %v3502_v57, inf }
  0x97   : > { %vm1004_vm9 = vcmp.eq.f32.partialorder %v3502_v57, 0.0  ;;  %v1005_v47 = vand.u32 2147483648, %v3502_v57  ;;  %2719 = vrsqrt.f32 %v3550_v41  ;;  %v3566_v39 = vadd.f32 %v961_v43, %v953_v42 }
  0x98   : > { %v2714_v1 = vpop.eup %2713  ;;  %v892_v18 = vsel %vm891_vm6, %v3488_v40, %v890_v2  ;;  %v1076_v24 = vmul.f32 %v1060_v53, %v1060_v53  ;;  %v1084_v3 = vmul.f32 %v1068_v23, %v1068_v23  ;;  %v1182_v25 = vsub.f32 %v3154_v48, %v3184_v61 }
  0x99   : > { %v895_v29 = vsel %vm893_vm7, %v894_v62, %v892_v18  ;;  %v1001_v58 = vmul.f32 %v2714_v1, %v3502_v57  ;;  %v1190_v15 = vsub.f32 %v3145_v44, %v3142_v36  ;;  %vm1113_vm10 = vcmp.eq.f32.partialorder %v3518_v8, inf }
  0x9a   : > { %915 = vadd.xlane.f32.xlu0 %v895_v29  ;;  %vm1115_vm11 = vcmp.eq.f32.partialorder %v3518_v8, 0.0  ;;  %v1116_v7 = vand.u32 2147483648, %v3518_v8  ;;  %2721 = vrsqrt.f32 %v3566_v39  ;;  %v3582_v5 = vadd.f32 %v1084_v3, %v1076_v24 }
  0x9b   : > { %v2716_v26 = vpop.eup %2715  ;;  %v1003_v40 = vsel %vm1002_vm8, %v3502_v57, %v1001_v58  ;;  %v1198_v48 = vmul.f32 %v1182_v25, %v1182_v25  ;;  %v1206_v13 = vmul.f32 %v1190_v15, %v1190_v15  ;;  %v1183_v34 = vsub.f32 %v3165_v52, %v3184_v61 }
  0x9c   : > { %v1006_v44 = vsel %vm1004_vm9, %v1005_v47, %v1003_v40  ;;  %v1112_v51 = vmul.f32 %v2716_v26, %v3518_v8  ;;  %v1191_v28 = vsub.f32 %v3149_v46, %v3142_v36  ;;  %vm773_vm12 = vcmp.eq.f32.partialorder %v3534_v17, inf }
  0x9d   : > { %1036 = vadd.xlane.f32.xlu1 %v1006_v44  ;;  %vm775_vm13 = vcmp.eq.f32.partialorder %v3534_v17, 0.0  ;;  %v776_v22 = vand.u32 2147483648, %v3534_v17  ;;  %2723 = vrsqrt.f32 %v3582_v5  ;;  %v3598_v10 = vadd.f32 %v1206_v13, %v1198_v48 }
  0x9e   : > { %v2718_v16 = vpop.eup %2717  ;;  %v1114_v57 = vsel %vm1113_vm10, %v3518_v8, %v1112_v51  ;;  %v1199_v52 = vmul.f32 %v1183_v34, %v1183_v34  ;;  %v1207_v9 = vmul.f32 %v1191_v28, %v1191_v28  ;;  %v938_v30 = vsub.f32 %v3349_v59, %v3130_v20 }
  0x9f   : > { %v1117_v46 = vsel %vm1115_vm11, %v1116_v7, %v1114_v57  ;;  %v772_v6 = vmul.f32 %v2718_v16, %v3534_v17  ;;  %v946_v14 = vsub.f32 %v3196_v19, %v3116_v11  ;;  %vm898_vm14 = vcmp.eq.f32.partialorder %v3550_v41, inf }
  0xa0   : > { %1157 = vadd.xlane.f32.xlu0 %v1117_v46  ;;  %vm900_vm15 = vcmp.eq.f32.partialorder %v3550_v41, 0.0  ;;  %v901_v31 = vand.u32 2147483648, %v3550_v41  ;;  %2725 = vrsqrt.f32 %v3598_v10  ;;  %v3614_v32 = vadd.f32 %v1207_v9, %v1199_v52 }
  0xa1   : > { %v2720_v62 = vpop.eup %2719  ;;  %v774_v8 = vsel %vm773_vm12, %v3534_v17, %v772_v6  ;;  %v954_v63 = vmul.f32 %v938_v30, %v938_v30  ;;  %v962_v42 = vmul.f32 %v946_v14, %v946_v14  ;;  %v1061_v2 = vsub.f32 %v3224_v35, %v3132_v21 }
  0xa2   : > { %v777_v43 = vsel %vm775_vm13, %v776_v22, %v774_v8  ;;  %v897_v45 = vmul.f32 %v2720_v62, %v3550_v41  ;;  %v1069_v53 = vsub.f32 %v3160_v50, %v3118_v12  ;;  %vm1009_vm0 = vcmp.eq.f32.partialorder %v3566_v39, inf }
  0xa3   : > { %792 = vadd.xlane.f32.xlu1 %v777_v43  ;;  %vm1011_vm1 = vcmp.eq.f32.partialorder %v3566_v39, 0.0  ;;  %v1012_v23 = vand.u32 2147483648, %v3566_v39  ;;  %2727 = vrsqrt.f32 %v3614_v32  ;;  %v3630_v1 = vadd.f32 %v962_v42, %v954_v63 }
  0xa4   : > { %v2722_v47 = vpop.eup %2721  ;;  %v899_v17 = vsel %vm898_vm14, %v3550_v41, %v897_v45  ;;  %v1077_v18 = vmul.f32 %v1061_v2, %v1061_v2  ;;  %v1085_v24 = vmul.f32 %v1069_v53, %v1069_v53  ;;  %v1184_v58 = vsub.f32 %v3174_v56, %v3184_v61 }
  0xa5   : > { %v902_v3 = vsel %vm900_vm15, %v901_v31, %v899_v17  ;;  %v1008_v29 = vmul.f32 %v2722_v47, %v3566_v39  ;;  %v1192_v25 = vsub.f32 %v3157_v49, %v3142_v36  ;;  %vm1120_vm2 = vcmp.eq.f32.partialorder %v3582_v5, inf }
  0xa6   : > { %917 = vadd.xlane.f32.xlu0 %v902_v3  ;;  %vm1122_vm3 = vcmp.eq.f32.partialorder %v3582_v5, 0.0  ;;  %v1123_v15 = vand.u32 2147483648, %v3582_v5  ;;  %2729 = vrsqrt.f32 %v3630_v1  ;;  %v3646_v26 = vadd.f32 %v1085_v24, %v1077_v18 }
  0xa7   : > { %v2724_v7 = vpop.eup %2723  ;;  %v1010_v41 = vsel %vm1009_vm0, %v3566_v39, %v1008_v29  ;;  %v1200_v56 = vmul.f32 %v1184_v58, %v1184_v58  ;;  %v1208_v40 = vmul.f32 %v1192_v25, %v1192_v25  ;;  %v939_v13 = vsub.f32 %v3358_v60, %v3130_v20 }
  0xa8   : > { %v1013_v49 = vsel %vm1011_vm1, %v1012_v23, %v1010_v41  ;;  %v1119_v48 = vmul.f32 %v2724_v7, %v3582_v5  ;;  %v947_v44 = vsub.f32 %v3218_v33, %v3116_v11  ;;  %vm1224_vm4 = vcmp.eq.f32.partialorder %v3598_v10, inf }
  0xa9   : > { %1038 = vadd.xlane.f32.xlu1 %v1013_v49  ;;  %vm1226_vm5 = vcmp.eq.f32.partialorder %v3598_v10, 0.0  ;;  %v1227_v51 = vand.u32 2147483648, %v3598_v10  ;;  %2731 = vrsqrt.f32 %v3646_v26  ;;  %v3662_v28 = vadd.f32 %v1208_v40, %v1200_v56 }
  0xaa   : > { %v2726_v34 = vpop.eup %2725  ;;  %v1121_v39 = vsel %vm1120_vm2, %v3582_v5, %v1119_v48  ;;  %v955_v20 = vmul.f32 %v939_v13, %v939_v13  ;;  %v963_v22 = vmul.f32 %v947_v44, %v947_v44  ;;  %v1062_v57 = vsub.f32 %v3233_v38, %v3132_v21  ;;  %v2775_v13 = vld [vmem:[#allocation3 + $0x38] sm:$0xff] }
  0xab   : > { %v1124_v11 = vsel %vm1122_vm3, %v1123_v15, %v1121_v39  ;;  %v1223_v16 = vmul.f32 %v2726_v34, %v3598_v10  ;;  %v1070_v52 = vsub.f32 %v3171_v55, %v3118_v12  ;;  %vm1231_vm6 = vcmp.eq.f32.partialorder %v3614_v32, inf }
  0xac   : > { %1159 = vadd.xlane.f32.xlu0 %v1124_v11  ;;  %vm1233_vm7 = vcmp.eq.f32.partialorder %v3614_v32, 0.0  ;;  %v1234_v9 = vand.u32 2147483648, %v3614_v32  ;;  %2733 = vrsqrt.f32 %v3662_v28  ;;  %v3678_v6 = vadd.f32 %v963_v22, %v955_v20 }
  0xad   : > { %v2728_v46 = vpop.eup %2727  ;;  %v1225_v5 = vsel %vm1224_vm4, %v3598_v10, %v1223_v16  ;;  %v1078_v30 = vmul.f32 %v1062_v57, %v1062_v57  ;;  %v1086_v14 = vmul.f32 %v1070_v52, %v1070_v52  ;;  %v1185_v8 = vsub.f32 %v3229_v37, %v3184_v61 }
  0xae   : > { %v1228_v31 = vsel %vm1226_vm5, %v1227_v51, %v1225_v5  ;;  %v1230_v62 = vmul.f32 %v2728_v46, %v3614_v32  ;;  %v1193_v63 = vsub.f32 %v3168_v54, %v3142_v36  ;;  %vm1016_vm8 = vcmp.eq.f32.partialorder %v3630_v1, inf }
  0xaf   : > { %1278 = vadd.xlane.f32.xlu1 %v1228_v31  ;;  %vm1018_vm9 = vcmp.eq.f32.partialorder %v3630_v1, 0.0  ;;  %v1019_v42 = vand.u32 2147483648, %v3630_v1  ;;  %2735 = vrsqrt.f32 %v3678_v6  ;;  %v3694_v45 = vadd.f32 %v1086_v14, %v1078_v30  ;;  %v2776_v14 = vld [vmem:[#allocation3 + $0x48] sm:$0xff] }
  0xb0   : > { %v2730_v43 = vpop.eup %2729  ;;  %v1232_v10 = vsel %vm1231_vm6, %v3614_v32, %v1230_v62  ;;  %v1201_v37 = vmul.f32 %v1185_v8, %v1185_v8  ;;  %v1209_v2 = vmul.f32 %v1193_v63, %v1193_v63  ;;  %v1063_v23 = vsub.f32 %v3349_v59, %v3132_v21 }
  0xb1   : > { %v1235_v54 = vsel %vm1233_vm7, %v1234_v9, %v1232_v10  ;;  %v1015_v53 = vmul.f32 %v2730_v43, %v3630_v1  ;;  %v1071_v47 = vsub.f32 %v3196_v19, %v3118_v12  ;;  %vm1127_vm10 = vcmp.eq.f32.partialorder %v3646_v26, inf }
  0xb2   : > { %1280 = vadd.xlane.f32.xlu0 %v1235_v54  ;;  %vm1129_vm11 = vcmp.eq.f32.partialorder %v3646_v26, 0.0  ;;  %v1130_v17 = vand.u32 2147483648, %v3646_v26  ;;  %2737 = vrsqrt.f32 %v3694_v45  ;;  %v3710_v24 = vadd.f32 %v1209_v2, %v1201_v37 }
  0xb3   : > { %v2732_v18 = vpop.eup %2731  ;;  %v1017_v32 = vsel %vm1016_vm8, %v3630_v1, %v1015_v53  ;;  %v1079_v3 = vmul.f32 %v1063_v23, %v1063_v23  ;;  %v1087_v29 = vmul.f32 %v1071_v47, %v1071_v47  ;;  %v1186_v25 = vsub.f32 %v3224_v35, %v3184_v61 }
  0xb4   : > { %v1020_v12 = vsel %vm1018_vm9, %v1019_v42, %v1017_v32  ;;  %v1126_v58 = vmul.f32 %v2732_v18, %v3646_v26  ;;  %v1194_v15 = vsub.f32 %v3160_v50, %v3142_v36  ;;  %vm1238_vm12 = vcmp.eq.f32.partialorder %v3662_v28, inf }
  0xb5   : > { %1040 = vadd.xlane.f32.xlu1 %v1020_v12  ;;  %vm1240_vm13 = vcmp.eq.f32.partialorder %v3662_v28, 0.0  ;;  %v1241_v7 = vand.u32 2147483648, %v3662_v28  ;;  %2739 = vrsqrt.f32 %v3710_v24  ;;  %v3726_v56 = vadd.f32 %v1087_v29, %v1079_v3 }
  0xb6   : > { %v2734_v41 = vpop.eup %2733  ;;  %v1128_v1 = vsel %vm1127_vm10, %v3646_v26, %v1126_v58  ;;  %v1202_v35 = vmul.f32 %v1186_v25, %v1186_v25  ;;  %v1210_v40 = vmul.f32 %v1194_v15, %v1194_v15  ;;  %v1064_v48 = vsub.f32 %v3358_v60, %v3132_v21 }
  0xb7   : > { %v1131_v50 = vsel %vm1129_vm11, %v1130_v17, %v1128_v1  ;;  %v1237_v49 = vmul.f32 %v2734_v41, %v3662_v28  ;;  %v1072_v44 = vsub.f32 %v3218_v33, %v2775_v13  ;;  %vm1023_vm14 = vcmp.eq.f32.partialorder %v3678_v6, inf }
  0xb8   : > { %1161 = vadd.xlane.f32.xlu0 %v1131_v50  ;;  %vm1025_vm15 = vcmp.eq.f32.partialorder %v3678_v6, 0.0  ;;  %v1026_v51 = vand.u32 2147483648, %v3678_v6  ;;  %2741 = vrsqrt.f32 %v3726_v56  ;;  %v3741_v39 = vadd.f32 %v1210_v40, %v1202_v35 }
  0xb9   : > { %v2736_v34 = vpop.eup %2735  ;;  %v1239_v26 = vsel %vm1238_vm12, %v3662_v28, %v1237_v49  ;;  %v1080_v21 = vmul.f32 %v1064_v48, %v1064_v48  ;;  %v1088_v20 = vmul.f32 %v1072_v44, %v1072_v44  ;;  %v1187_v16 = vsub.f32 %v3233_v38, %v3184_v61 }
  0xba   : > { %v1242_v22 = vsel %vm1240_vm13, %v1241_v7, %v1239_v26  ;;  %v1022_v11 = vmul.f32 %v2736_v34, %v3678_v6  ;;  %v1195_v57 = vsub.f32 %v3171_v55, %v3142_v36  ;;  %vm1134_vm0 = vcmp.eq.f32.partialorder %v3694_v45, inf }
  0xbb   : > { %1282 = vadd.xlane.f32.xlu1 %v1242_v22  ;;  %vm1136_vm1 = vcmp.eq.f32.partialorder %v3694_v45, 0.0  ;;  %v1137_v52 = vand.u32 2147483648, %v3694_v45  ;;  %2743 = vrsqrt.f32 %v3741_v39  ;;  %v1096_v46 = vadd.f32 %v1088_v20, %v1080_v21 }
  0xbc   : > { %v2738_v9 = vpop.eup %2737  ;;  %v1024_v28 = vsel %vm1023_vm14, %v3678_v6, %v1022_v11  ;;  %v1203_v5 = vmul.f32 %v1187_v16, %v1187_v16  ;;  %v1211_v38 = vmul.f32 %v1195_v57, %v1195_v57  ;;  %v1188_v30 = vsub.f32 %v3349_v59, %v3184_v61  ;;  %v1892_v11 = vld [vmem:[%s4164_s4] sm:$0xff]  ;;  %v1893_v16 = vld [vmem:[%s4164_s4 + $0x8] sm:$0xff] }
  0xbd   : > { %v1027_v36 = vsel %vm1025_vm15, %v1026_v51, %v1024_v28  ;;  %v1133_v55 = vmul.f32 %v2738_v9, %v3694_v45  ;;  %v1196_v31 = vsub.f32 %v3196_v19, %v2776_v14  ;;  %vm1245_vm2 = vcmp.eq.f32.partialorder %v3710_v24, inf  ;;  %v1895_v9 = vld [vmem:[%s4164_s4 + $0x18] sm:$0xff] }
  0xbe   : > { %1042 = vadd.xlane.f32.xlu0 %v1027_v36  ;;  %vm1247_vm3 = vcmp.eq.f32.partialorder %v3710_v24, 0.0  ;;  %v1248_v62 = vand.u32 2147483648, %v3710_v24  ;;  %2745 = vrsqrt.f32 %v1096_v46  ;;  %v1219_v63 = vadd.f32 %v1211_v38, %v1203_v5  ;;  %v1520_v36 = vld [vmem:[%s466_s18] sm:$0xff] }
  0xbf   : > { %v2740_v8 = vpop.eup %2739  ;;  %v1135_v6 = vsel %vm1134_vm0, %v3694_v45, %v1133_v55  ;;  %v1204_v42 = vmul.f32 %v1188_v30, %v1188_v30  ;;  %v1212_v43 = vmul.f32 %v1196_v31, %v1196_v31  ;;  %v1189_v10 = vsub.f32 %v3358_v60, %v3184_v61  ;;  %v2777_v30 = vld [vmem:[%s3109_s16 + $0x8] sm:$0xff] }
  0xc0   : > { %v1138_v59 = vsel %vm1136_vm1, %v1137_v52, %v1135_v6  ;;  %v1244_v19 = vmul.f32 %v2740_v8, %v3710_v24  ;;  %v1197_v37 = vsub.f32 %v3218_v33, %v2776_v14  ;;  %vm1141_vm4 = vcmp.eq.f32.partialorder %v3726_v56, inf }
  0xc1   : > { %1163 = vadd.xlane.f32.xlu1 %v1138_v59  ;;  %v1144_v2 = vand.u32 2147483648, %v3726_v56  ;;  %2747 = vrsqrt.f32 %v1219_v63  ;;  %v1220_v45 = vadd.f32 %v1212_v43, %v1204_v42  ;;  %v1205_v23 = vmul.f32 %v1189_v10, %v1189_v10 }
  0xc2   : > { %v2742_v54 = vpop.eup %2741  ;;  %v1246_v53 = vsel %vm1245_vm2, %v3710_v24, %v1244_v19  ;;  %v1213_v47 = vmul.f32 %v1197_v37, %v1197_v37  ;;  %vm1143_vm5 = vcmp.eq.f32.partialorder %v3726_v56, 0.0  ;;  %vm1252_vm6 = vcmp.eq.f32.partialorder %v3741_v39, inf }
  0xc3   : > { %v1249_v17 = vsel %vm1247_vm3, %v1248_v62, %v1246_v53  ;;  %v1140_v61 = vmul.f32 %v2742_v54, %v3726_v56  ;;  %2749 = vrsqrt.f32 %v1220_v45  ;;  %v1255_v18 = vand.u32 2147483648, %v3741_v39 }
  0xc4   : > { %1284 = vadd.xlane.f32.xlu0 %v1249_v17  ;;  %v1221_v32 = vadd.f32 %v1213_v47, %v1205_v23  ;;  %vm1254_vm7 = vcmp.eq.f32.partialorder %v3741_v39, 0.0  ;;  %vm1148_vm8 = vcmp.eq.f32.partialorder %v1096_v46, inf  ;;  %v1151_v58 = vand.u32 2147483648, %v1096_v46 }
  0xc5   : > { %v2744_v33 = vpop.eup %2743  ;;  %v1142_v60 = vsel %vm1141_vm4, %v3726_v56, %v1140_v61  ;;  %vm1150_vm9 = vcmp.eq.f32.partialorder %v1096_v46, 0.0  ;;  %vm1259_vm10 = vcmp.eq.f32.partialorder %v1219_v63, inf  ;;  %v1262_v1 = vand.u32 2147483648, %v1219_v63 }
  0xc6   : > { %v1145_v3 = vsel %vm1143_vm5, %v1144_v2, %v1142_v60  ;;  %v1251_v29 = vmul.f32 %v2744_v33, %v3741_v39  ;;  %2751 = vrsqrt.f32 %v1221_v32  ;;  %vm1261_vm11 = vcmp.eq.f32.partialorder %v1219_v63, 0.0  ;;  %v2524_v60 = vld [vmem:[%s4193_s2] ss:$0 sm:$0xff] }
  0xc7   : > { %1165 = vadd.xlane.f32.xlu1 %v1145_v3  ;;  %vm1266_vm12 = vcmp.eq.f32.partialorder %v1220_v45, inf  ;;  %v1269_v49 = vand.u32 2147483648, %v1220_v45  ;;  %vm1268_vm13 = vcmp.eq.f32.partialorder %v1220_v45, 0.0  ;;  %vm1273_vm14 = vcmp.eq.f32.partialorder %v1221_v32, inf }
  0xc8   : > { %v2746_v24 = vpop.eup %2745  ;;  %v1253_v12 = vsel %vm1252_vm6, %v3741_v39, %v1251_v29  ;;  %v1276_v34 = vand.u32 2147483648, %v1221_v32  ;;  %vm1275_vm15 = vcmp.eq.f32.partialorder %v1221_v32, 0.0  ;;  %v3791_v22 = vand.u32 127, %v502_v0  ;;  %v1894_v0 = vld [vmem:[%s4164_s4 + $0x10] sm:$0xff] }
  0xc9   : > { %v1256_v25 = vsel %vm1254_vm7, %v1255_v18, %v1253_v12  ;;  %v1147_v15 = vmul.f32 %v2746_v24, %v1096_v46  ;;  %v2581_v57 = vpack.c.bf16 %v1893_v16, %v1892_v11  ;;  %v2927_v52 = vmov 0.0|0.0  }
  0xca   : > { %1286 = vadd.xlane.f32.xlu0 %v1256_v25  ;;  %2580 = vmatprep.subr.bf16.mxu1 %v2927_v52  ;;  %v2584_v28 = vpack.c.bf16 %v1895_v9, %v1894_v0  ;;  %v2928_v5 = vmov 0.0   ;;  %vm2929_vm0 = vmmov 0   ;;  %v2930_v38 = vmov 0  }
  0xcb   : > { %v2748_v7 = vpop.eup %2747  ;;  %v1149_v41 = vsel %vm1148_vm8, %v1096_v46, %v1147_v15  ;;  %2582 = vmatpush3.bf16.msra.mxu1 %v2581_v57  ;;  %v1896_v46 = vld [vmem:[%s4164_s4 + $0x20] sm:$0xff]  ;;  %2559 = vmatprep.mubr.msk.f32.mxu1 %vm2929_vm0, %v2928_v5  ;;  %vm1897_vm1 = vcmask 326656   ;;  %vm1358_vm2 = vcmask 1041409   ;;  %vm1360_vm3 = vcmask 1042434  }
  0xcc   : > { %v1152_v56 = vsel %vm1150_vm9, %v1151_v58, %v1149_v41  ;;  %v1258_v35 = vmul.f32 %v2748_v7, %v1219_v63  ;;  %2583 = vmatprep.subr.bf16.mxu1 %v2927_v52  ;;  %2669 = vset.pattern.permute.xlu0 %v2930_v38  ;;  %v2525_v7 = vld [vmem:[%s4163_s3] ss:$0 sm:$0xff]  ;;  %vm1362_vm4 = vcmask 1043459   ;;  %vm1364_vm5 = vcmask 1044484  }
  0xcd   : > { %1167 = vadd.xlane.f32.xlu1 %v1152_v56  ;;  %v2750_v40 = vpop.eup %2749  ;;  %2562 = vmatprep.subr.mxu0 %v2928_v5  ;;  %vm1366_vm6 = vcmask 1045509   ;;  %vm1368_vm7 = vcmask 1046534   ;;  %vm1370_vm8 = vcmask 1047559   ;;  %vm1373_vm9 = vcmask 64512  }
  0xce   : > { %v1260_v50 = vsel %vm1259_vm10, %v1219_v63, %v1258_v35  ;;  %v1265_v13 = vmul.f32 %v2750_v40, %v1220_v45  ;;  %2564 = vmatprep.mubr.msk.f32.mxu0 %vm2929_vm0, %v2928_v5 }
  0xcf   : > { %v1263_v48 = vsel %vm1261_vm11, %v1262_v1, %v1260_v50  ;;  %2585 = vmatpush3.bf16.msra.mxu1 %v2584_v28 }
  0xd0   : > { %1288 = vadd.xlane.f32.xlu0 %v1263_v48  ;;  %v2752_v44 = vpop.eup %2751  ;;  %v1267_v51 = vsel %vm1266_vm12, %v1220_v45, %v1265_v13  ;;  %2557 = vmatprep.subr.mxu1 %v2928_v5 }
  0xd1   : > { %v1270_v26 = vsel %vm1268_vm13, %v1269_v49, %v1267_v51  ;;  %v1272_v39 = vmul.f32 %v2752_v44, %v1221_v32 }
  0xd2   : > { %1290 = vadd.xlane.f32.xlu1 %v1270_v26 }
  0xd3   : > { %v1274_v21 = vsel %vm1273_vm14, %v1221_v32, %v1272_v39  ;;  %2558 = vmatpush3.msra.mxu1 %v1896_v46 }
  0xd4   : > { %v1277_v20 = vsel %vm1275_vm15, %v1276_v34, %v1274_v21  ;;  %2104 = vmatprep.subr.mxu1 %v2777_v30 }
  0xd5   : > { %1292 = vadd.xlane.f32.xlu0 %v1277_v20  ;;  %v2778_v20 = vld [vmem:[%s3109_s16] sm:$0xff]  ;;  %s2535_s16 = sshll.u32 %s2913_s22, 4 }
  0xd6   : > { %s4065_s13 = scalar_lea.hbm %s4170_s10, %s2535_s16 }
  0xda   : > { %v1869_v55 = vpop.xlane.xlu0 %1868 }
  0xdb   : > { %v1877_v32 = vadd.f32 %v2524_v60, %v1869_v55 }
  0xe3   : > { %1695 = vbcast.lane.b32.xlu1 %v3791_v22, 256 }
  0xeb   : > { %1522 = vperm.xlu0 %2669, %v1520_v36  }
  0xf4   : > { %v904_v14 = vpop.xlane.xlu1 %903 }
  0xf5   : > { %v779_v31 = vpop.xlane.xlu0 %778 }
  0xf6   : > { %v919_v62 = vadd.f32 %v904_v14, %v779_v31  ;;  %v1307_v14 = vstv %s1306_s27  ;;  %s2807_s27 = scalar_lea.vmem %s4067_s15, 16 }
  0xf7   : > { %p2808_p8 = scmp.ne.s32.totalorder %s4067_s15, %s2807_s27 }
  0xf8   : > { %v1029_v8 = vpop.xlane.xlu1 %1028 }
  0xf9   : > { %v906_v6 = vpop.xlane.xlu0 %905  ;;  %v1044_v26 = vadd.f32 %v1029_v8, %v919_v62  ;;  %p2809_p11 = pnand %p2808_p8, %p4194_p10 }
  0xfb   : > { %p2810_p13 = pneg %p2809_p11 }
  0xfc   : > { %v1154_v63 = vpop.xlane.xlu1 %1153 }
  0xfd   : > { %v908_v42 = vpop.xlane.xlu0 %907  ;;  %v1169_v57 = vadd.f32 %v1154_v63, %v1044_v26 }
 0x100   : > { %v781_v43 = vpop.xlane.xlu1 %780 }
 0x101   : > { %v1031_v59 = vpop.xlane.xlu0 %1030  ;;  %v920_v13 = vadd.f32 %v906_v6, %v781_v43 }
 0x103   : > { %v1045_v39 = vadd.f32 %v1031_v59, %v920_v13 }
 0x106   : > { %v783_v19 = vpop.xlane.xlu1 %782 }
 0x107   : > { %v921_v34 = vadd.f32 %v908_v42, %v783_v19  ;;  %v3840_v42 = vsub.s32 %v3791_v22, %v3097_v4 }
 0x109   : > { %v912_v10 = vpop.xlane.xlu0 %911 }
 0x10c   : > { %v787_v37 = vpop.xlane.xlu1 %786 }
 0x10d   : > { %v923_v36 = vadd.f32 %v912_v10, %v787_v37 }
 0x10f   : > { %v1156_v2 = vpop.xlane.xlu0 %1155 }
 0x110   : > { %v1170_v52 = vadd.f32 %v1156_v2, %v1045_v39 }
 0x112   : > { %v1033_v54 = vpop.xlane.xlu1 %1032 }
 0x113   : > { %v1046_v16 = vadd.f32 %v1033_v54, %v921_v34 }
 0x117   : > { %v910_v53 = vpop.xlane.xlu0 %909 }
 0x118   : > { %v785_v45 = vpop.xlane.xlu1 %784 }
 0x119   : > { %v922_v11 = vadd.f32 %v910_v53, %v785_v45 }
 0x11b   : > { %v789_v23 = vpop.xlane.xlu0 %788 }
 0x11e   : > { %v914_v47 = vpop.xlane.xlu1 %913 }
 0x11f   : > { %v924_v19 = vadd.f32 %v914_v47, %v789_v23 }
 0x121   : > { %v1035_v17 = vpop.xlane.xlu0 %1034 }
 0x122   : > { %v1047_v9 = vadd.f32 %v1035_v17, %v922_v11 }
 0x123   : > { %v3823_v61 = vpop.xlane.xlu1 %790 }
 0x127   : > { %v3825_v33 = vpop.xlane.xlu0 %915 }
 0x128   : > { %v925_v17 = vadd.f32 %v3825_v33, %v3823_v61 }
 0x12a   : > { %v1037_v18 = vpop.xlane.xlu1 %1036  ;;  %v1861_v3 = vpop.f32.mrb[0].mxu0 }
 0x12b   : > { %v1878_v24 = vmul.f32 2.0, %v1861_v3  ;;  %v1863_v12 = vpop.f32.mrb[1].mxu0  ;;  %v1048_v6 = vadd.f32 %v1037_v18, %v923_v36  ;;  %v1388_v36 = vsub.s32 2, %v3097_v4 }
 0x12d   : > { %v1158_v29 = vpop.xlane.xlu0 %1157  ;;  %v1879_v58 = vsub.f32 %v1877_v32, %v1878_v24 }
 0x12e   : > { %v1171_v28 = vadd.f32 %v1158_v29, %v1046_v16 }
 0x12f   : > { %v1880_v15 = vmax.f32 %v1879_v58, 0.0 }
 0x130   : > { %v793_v25 = vpop.xlane.xlu1 %792 }
 0x131   : > { %v1881_v1 = vsub.f32 0.0, %v1880_v15 }
 0x133   : > { %v918_v41 = vpop.xlane.xlu0 %917  ;;  %v1889_v56 = vmul.f32 %v2525_v7, %v1881_v1 }
 0x134   : > { %v926_v32 = vadd.f32 %v918_v41, %v793_v25 }
 0x135   : > { %v1890_v40 = vmul.f32 1.442695, %v1889_v56 }
 0x136   : > { %v1039_v35 = vpop.xlane.xlu1 %1038 }
 0x137   : > { %2753 = vpow2.f32 %v1890_v40  ;;  %v1049_v60 = vadd.f32 %v1039_v35, %v924_v19 }
 0x139   : > { %v1160_v50 = vpop.xlane.xlu0 %1159 }
 0x13a   : > { %v1172_v31 = vadd.f32 %v1160_v50, %v1047_v9  ;;  %v1972_v9 = vld [vmem:[%s4165_s5] sm:$0xff] }
 0x13b   : > { %2563 = vmatpush3.msra.mxu0 %v1972_v9 }
 0x13c   : > { %v1279_v49 = vpop.xlane.xlu1 %1278  ;;  %2567 = vmatprep.subr.mxu0 %v2928_v5 }
 0x13d   : > { %v1294_v55 = vadd.f32 %v1279_v49, %v1169_v57 }
 0x13f   : > { %v1281_v48 = vpop.xlane.xlu0 %1280  ;;  %v3842_v43 = vmul.f32 %v1307_v14, %v1294_v55 }
 0x140   : > { %v1295_v30 = vadd.f32 %v1281_v48, %v1170_v52 }
 0x141   : > { %v3833_v51 = vpop.eup %2753  ;;  %v1329_v10 = vrot.slane %v3842_v43, %v3840_v42 }
 0x142   : > { %v1041_v44 = vpop.xlane.xlu1 %1040  ;;  %2560 = vmatmul.mubr.msk.f32.vlgmr.msra.gmra.mrb[0].mxu1 %vm1897_vm1, %v3833_v51  ;;  %v3844_v63 = vmul.f32 %v1307_v14, %v1295_v30 }
 0x143   : > { %2105 = vmatpush1.msra.mxu1 %v2778_v20  ;;  %2168 = vmatprep.mubr.f32.mxu1 %v2928_v5  ;;  %v1050_v24 = vadd.f32 %v1041_v44, %v925_v17 }
 0x144   : > { %v1333_v37 = vrot.slane %v3844_v63, %v3840_v42 }
 0x145   : > { %v1162_v21 = vpop.xlane.xlu0 %1161 }
 0x146   : > { %v1173_v53 = vadd.f32 %v1162_v21, %v1048_v6  ;;  %v1359_v29 = vsel %vm1358_vm2, %v1333_v37, %v1329_v10  ;;  %v1396_v6 = vsub.s32 4, %v3097_v4 }
 0x148   : > { %v1283_v0 = vpop.xlane.xlu1 %1282 }
 0x149   : > { %v1296_v8 = vadd.f32 %v1283_v0, %v1171_v28 }
 0x14b   : > { %v1043_v46 = vpop.xlane.xlu0 %1042  ;;  %v3846_v54 = vmul.f32 %v1307_v14, %v1296_v8 }
 0x14c   : > { %v1051_v7 = vadd.f32 %v1043_v46, %v926_v32  ;;  %v1384_v46 = vsub.s32 1, %v3097_v4 }
 0x14d   : > { %v1337_v23 = vrot.slane %v3846_v54, %v3840_v42 }
 0x14e   : > { %v1164_v62 = vpop.xlane.xlu1 %1163 }
 0x14f   : > { %v1174_v12 = vadd.f32 %v1164_v62, %v1049_v60  ;;  %v1361_v33 = vsel %vm1360_vm3, %v1337_v23, %v1359_v29  ;;  %v1392_v62 = vsub.s32 3, %v3097_v4 }
 0x151   : > { %v1285_v59 = vpop.xlane.xlu0 %1284 }
 0x152   : > { %v1297_v2 = vadd.f32 %v1285_v59, %v1172_v31 }
 0x154   : > { %v1166_v45 = vpop.xlane.xlu1 %1165  ;;  %v3854_v18 = vmul.f32 %v1307_v14, %v1297_v2  ;;  %v1400_v2 = vsub.s32 5, %v3097_v4 }
 0x155   : > { %v1175_v1 = vadd.f32 %v1166_v45, %v1050_v24  ;;  %v1404_v45 = vsub.s32 6, %v3097_v4  ;;  %v1408_v24 = vsub.s32 7, %v3097_v4 }
 0x156   : > { %v1341_v58 = vrot.slane %v3854_v18, %v3840_v42 }
 0x157   : > { %v1287_v47 = vpop.xlane.xlu0 %1286 }
 0x158   : > { %v1298_v3 = vadd.f32 %v1287_v47, %v1173_v53  ;;  %v1363_v35 = vsel %vm1362_vm4, %v1341_v58, %v1361_v33 }
 0x15a   : > { %v3861_v15 = vmul.f32 %v1307_v14, %v1298_v3  ;;  %v1168_v61 = vpop.xlane.xlu1 %1167 }
 0x15b   : > { %v1176_v40 = vadd.f32 %v1168_v61, %v1051_v7 }
 0x15c   : > { %v1345_v25 = vrot.slane %v3861_v15, %v3840_v42 }
 0x15d   : > { %v1289_v41 = vpop.xlane.xlu0 %1288 }
 0x15e   : > { %v1299_v56 = vadd.f32 %v1289_v41, %v1174_v12  ;;  %v1365_v13 = vsel %vm1364_vm5, %v1345_v25, %v1363_v35 }
 0x15f   : > { %v1291_v49 = vpop.xlane.xlu1 %1290 }
 0x160   : > { %v3867_v50 = vmul.f32 %v1307_v14, %v1299_v56  ;;  %v1300_v48 = vadd.f32 %v1291_v49, %v1175_v1 }
 0x162   : > { %v1349_v44 = vrot.slane %v3867_v50, %v3840_v42  ;;  %v3872_v34 = vmul.f32 %v1307_v14, %v1300_v48  ;;  %v1293_v26 = vpop.xlane.xlu0 %1292 }
 0x163   : > { %v1301_v39 = vadd.f32 %v1293_v26, %v1176_v40  ;;  %v1696_v28 = vpop.permute.xlu1 %1695 }
 0x164   : > { %v1367_v21 = vsel %vm1366_vm6, %v1349_v44, %v1365_v13  ;;  %v1353_v20 = vrot.slane %v3872_v34, %v3840_v42 }
 0x165   : > { %v3877_v11 = vmul.f32 %v1307_v14, %v1301_v39 }
 0x166   : > { %v1369_v16 = vsel %vm1368_vm7, %v1353_v20, %v1367_v21 }
 0x167   : > { %v1357_v57 = vrot.slane %v3877_v11, %v3840_v42 }
 0x169   : > { %v1371_v52 = vsel %vm1370_vm8, %v1357_v57, %v1369_v16 }
 0x16a   : > { %v1374_v0 = vsel %vm1373_vm9, %v1371_v52, -inf  ;;  %v1523_v47 = vpop.permute.xlu0 %1522 }
 0x16b   : > { %1375 = vmax.xlane.f32.xlu1 %v1374_v0  ;;  %vm1524_vm1 = vcmp.eq.s32.totalorder %v3791_v22, %v1523_v47 }
 0x16c   : > { %v2523_v3 = vsel %vm1524_vm1, 1.0, %v2928_v5 }
 0x16d   : > { %v1531_v12 = vrot.slane %v2523_v3, %v3138_v27  ;;  %v1538_v61 = vrot.slane %v2523_v3, %v1384_v46  ;;  %v1545_v25 = vrot.slane %v2523_v3, %v1388_v36  ;;  %v1552_v4 = vrot.slane %v2523_v3, %v1392_v62 }
 0x16e   : > { %v1559_v56 = vrot.slane %v2523_v3, %v1396_v6  ;;  %v1566_v49 = vrot.slane %v2523_v3, %v1400_v2  ;;  %v1573_v44 = vrot.slane %v2523_v3, %v1404_v45  ;;  %v1580_v21 = vrot.slane %v2523_v3, %v1408_v24 }
 0x1f8   : > { %v3890_v55 = vpop.xlane.xlu1 %1375 }
 0x1f9   : > { %v1381_v30 = vrot.slane %v3890_v55, %v3138_v27  ;;  %v3895_v14 = vrot.slane %v3890_v55, %v1384_v46  ;;  %v1389_v31 = vrot.slane %v3890_v55, %v1388_v36  ;;  %v3905_v19 = vrot.slane %v3890_v55, %v1392_v62 }
 0x1fa   : > { %v1397_v10 = vrot.slane %v3890_v55, %v1396_v6  ;;  %v3912_v53 = vrot.slane %v3890_v55, %v1400_v2  ;;  %v1405_v23 = vrot.slane %v3890_v55, %v1404_v45  ;;  %v3927_v58 = vrot.slane %v3890_v55, %v1408_v24 }
 0x1fb   : > { %vm1686_vm10 = vcmp.eq.f32.partialorder %v3842_v43, %v1381_v30  ;;  %vm1687_vm11 = vcmp.eq.f32.partialorder %v3844_v63, %v3895_v14  ;;  %vm1688_vm12 = vcmp.eq.f32.partialorder %v3846_v54, %v1389_v31  ;;  %vm1689_vm13 = vcmp.eq.f32.partialorder %v3854_v18, %v3905_v19 }
 0x1fc   : > { %v1697_v8 = vsel %vm1686_vm10, %v1696_v28, 8  ;;  %v1698_v59 = vsel %vm1687_vm11, %v1696_v28, 8  ;;  %v1699_v37 = vsel %vm1688_vm12, %v1696_v28, 8  ;;  %vm1690_vm14 = vcmp.eq.f32.partialorder %v3861_v15, %v1397_v10 }
 0x1fd   : > { %1706 = vperm.xlu0 %2669, %v1697_v8   ;;  %v3916_v17 = vsel %vm1690_vm14, %v1696_v28, 8  ;;  %v1700_v60 = vsel %vm1689_vm13, %v1696_v28, 8  ;;  %vm1691_vm15 = vcmp.eq.f32.partialorder %v3867_v50, %v3912_v53  ;;  %vm1692_vm10 = vcmp.eq.f32.partialorder %v3872_v34, %v1405_v23 }
 0x1fe   : > { %v1702_v32 = vsel %vm1691_vm15, %v1696_v28, 8  ;;  %v1703_v29 = vsel %vm1692_vm10, %v1696_v28, 8  ;;  %vm1693_vm11 = vcmp.eq.f32.partialorder %v3877_v11, %v3927_v58  ;;  %v1418_v27 = vsub.f32 %v3842_v43, %v1381_v30 }
 0x1ff   : > { %v1704_v1 = vsel %vm1693_vm11, %v1696_v28, 8  ;;  %v1420_v40 = vsub.f32 %v3846_v54, %v1389_v31  ;;  %v1422_v13 = vsub.f32 %v3861_v15, %v1397_v10  ;;  %v1424_v26 = vsub.f32 %v3872_v34, %v1405_v23 }
 0x200   : > { %v1426_v35 = vmul.f32 1.442695, %v1418_v27 }
 0x201   : > { %1709 = vperm.xlu0 %2669, %v1698_v59   ;;  %v1430_v48 = vmul.f32 1.442695, %v1420_v40  ;;  %v1434_v39 = vmul.f32 1.442695, %v1422_v13  ;;  %v1438_v20 = vmul.f32 1.442695, %v1424_v26 }
 0x205   : > { %1712 = vperm.xlu0 %2669, %v1699_v37  }
 0x209   : > { %1715 = vperm.xlu0 %2669, %v1700_v60  }
 0x20d   : > { %1721 = vperm.xlu0 %2669, %v1702_v32  }
 0x211   : > { %1724 = vperm.xlu0 %2669, %v1703_v29  }
 0x215   : > { %1533 = vbcast.lane.b32.xlu0 %v1531_v12, 256  ;;  %v1967_v33 = vpop.f32.mrb[0].mxu1 }
 0x216   : > { %v1968_v22 = vadd.f32 1e-08, %v1967_v33  ;;  %v2561_v7 = vpop.f32.mrb[1].mxu1 }
 0x218   : > { %2755 = vrcp.f32 %v1968_v22 }
 0x219   : > { %1540 = vbcast.lane.b32.xlu0 %v1538_v61, 256  ;;  %2757 = vpow2.f32 %v1426_v35 }
 0x21a   : > { %2759 = vpow2.f32 %v1430_v48 }
 0x21b   : > { %2761 = vpow2.f32 %v1434_v39 }
 0x21c   : > { %2763 = vpow2.f32 %v1438_v20 }
 0x21d   : > { %1727 = vperm.xlu0 %2669, %v1704_v1  }
 0x221   : > { %1547 = vbcast.lane.b32.xlu0 %v1545_v25, 256 }
 0x222   : > { %v2756_v41 = vpop.eup %2755 }
 0x223   : > { %2565 = vmatmul.mubr.msk.f32.vlgmr.msra.gmra.mrb[2].mxu0 %vm1373_vm9, %v2756_v41  ;;  %v2758_v16 = vpop.eup %2757 }
 0x224   : > { %2569 = vmatprep.mubr.msk.f32.mxu0 %vm2929_vm0, %v2928_v5  ;;  %v2760_v57 = vpop.eup %2759  ;;  %vm481_vm0 = vcmask 0  }
 0x225   : > { %1554 = vbcast.lane.b32.xlu0 %v1552_v4, 256  ;;  %v2762_v52 = vpop.eup %2761  ;;  %482 = vst.msk [vmem:[%s4031_s7] sm:$0x1] %vm481_vm0, %v2928_v5 }
 0x226   : > { %v2764_v0 = vpop.eup %2763 }
 0x229   : > { %1561 = vbcast.lane.b32.xlu0 %v1559_v56, 256 }
 0x22d   : > { %1568 = vbcast.lane.b32.xlu0 %v1566_v49, 256  ;;  %v2931_v49 = vmov 1.0  }
 0x231   : > { %1575 = vbcast.lane.b32.xlu0 %v1573_v44, 256 }
 0x235   : > { %1582 = vbcast.lane.b32.xlu0 %v1580_v21, 256 }
 0x239   : > { %1451 = vperm.xlu0 %2669, %v2758_v16  }
 0x23d   : > { %1457 = vperm.xlu0 %2669, %v2760_v57  }
 0x241   : > { %1463 = vperm.xlu0 %2669, %v2762_v52  }
 0x245   : > { %1469 = vperm.xlu0 %2669, %v2764_v0  }
 0x27c   : > { %v1707_v9 = vpop.permute.xlu0 %1706 }
 0x27d   : > { %v1732_v28 = vrot.slane %v1707_v9, %v3840_v42 }
 0x280   : > { %v1710_v46 = vpop.permute.xlu0 %1709 }
 0x281   : > { %v1736_v36 = vrot.slane %v1710_v46, %v3840_v42 }
 0x283   : > { %v1761_v30 = vsel %vm1358_vm2, %v1736_v36, %v1732_v28 }
 0x284   : > { %v1713_v31 = vpop.permute.xlu0 %1712 }
 0x285   : > { %v1740_v62 = vrot.slane %v1713_v31, %v3840_v42 }
 0x287   : > { %v1762_v8 = vsel %vm1360_vm3, %v1740_v62, %v1761_v30 }
 0x288   : > { %v1716_v6 = vpop.permute.xlu0 %1715 }
 0x289   : > { %v1744_v59 = vrot.slane %v1716_v6, %v3840_v42 }
 0x28b   : > { %v3945_v2 = vsel %vm1362_vm4, %v1744_v59, %v1762_v8 }
 0x28c   : > { %v3947_v10 = vpop.permute.xlu0 %1721 }
 0x28d   : > { %v1752_v39 = vrot.slane %v3947_v10, %v3840_v42 }
 0x290   : > { %v3949_v37 = vpop.permute.xlu0 %1724 }
 0x291   : > { %v1756_v21 = vrot.slane %v3949_v37, %v3840_v42 }
 0x294   : > { %v1534_v45 = vpop.permute.xlu0 %1533 }
 0x295   : > { %v1592_v60 = vmul.f32 %v1534_v45, %v3842_v43 }
 0x297   : > { %1609 = vperm.xlu0 %2669, %v1592_v60  }
 0x298   : > { %v1541_v23 = vpop.permute.xlu0 %1540 }
 0x29c   : > { %v3952_v47 = vpop.permute.xlu0 %1727 }
 0x29d   : > { %v1760_v16 = vrot.slane %v3952_v47, %v3840_v42 }
 0x2a0   : > { %v1548_v32 = vpop.permute.xlu0 %1547 }
 0x2a1   : > { %v1594_v3 = vmul.f32 %v1548_v32, %v3846_v54  ;;  %v1419_v54 = vsub.f32 %v3844_v63, %v3895_v14 }
 0x2a3   : > { %1615 = vperm.xlu0 %2669, %v1594_v3   ;;  %v1428_v25 = vmul.f32 1.442695, %v1419_v54 }
 0x2a4   : > { %v1555_v29 = vpop.permute.xlu0 %1554 }
 0x2a5   : > { %2765 = vpow2.f32 %v1428_v25  ;;  %v1595_v35 = vmul.f32 %v1555_v29, %v3854_v18 }
 0x2a8   : > { %v1562_v24 = vpop.permute.xlu0 %1561 }
 0x2a9   : > { %v1596_v12 = vmul.f32 %v1562_v24, %v3861_v15  ;;  %v1421_v15 = vsub.f32 %v3854_v18, %v3905_v19 }
 0x2ab   : > { %1621 = vperm.xlu0 %2669, %v1596_v12   ;;  %v1432_v4 = vmul.f32 1.442695, %v1421_v15 }
 0x2ac   : > { %v1569_v61 = vpop.permute.xlu0 %1568 }
 0x2ad   : > { %2767 = vpow2.f32 %v1432_v4 }
 0x2af   : > { %v2766_v27 = vpop.eup %2765 }
 0x2b0   : > { %v1576_v33 = vpop.permute.xlu0 %1575 }
 0x2b1   : > { %v1598_v22 = vmul.f32 %v1576_v33, %v3872_v34  ;;  %v1423_v34 = vsub.f32 %v3867_v50, %v3912_v53  ;;  %v1593_v53 = vmul.f32 %v1541_v23, %v3844_v63 }
 0x2b3   : > { %1627 = vperm.xlu0 %2669, %v1598_v22   ;;  %v1436_v41 = vmul.f32 1.442695, %v1423_v34 }
 0x2b5   : > { %2769 = vpow2.f32 %v1436_v41 }
 0x2b7   : > { %v2768_v14 = vpop.eup %2767 }
 0x2bf   : > { %v2770_v19 = vpop.eup %2769 }
 0x2f6   : > { %v2042_v7 = vpop.f32.mrb[2].mxu0 }
 0x2f7   : > { %v2046_v43 = vmul.f32 %v3833_v51, %v2042_v7  ;;  %v2566_v1 = vpop.f32.mrb[3].mxu0  ;;  %v1425_v51 = vsub.f32 %v3877_v11, %v3927_v58  ;;  %v1597_v58 = vmul.f32 %v1569_v61, %v3867_v50 }
 0x2f9   : > { %2568 = vmatpush3.msra.mxu0 %v2046_v43  ;;  %2057 = vxpose.xlu1.b32.start.end [1/1] (short) (narrow) %v2046_v43, 40 }
 0x2fa   : > { %2570 = vmatmul.mubr.msk.f32.vlgmr.msra.gmra.mrb[4].mxu0 %vm1373_vm9, %v2931_v49 }
 0x317   : > { %2670 = vset.pattern.permute.xlu1 %v2930_v38  ;;  %v1440_v38 = vmul.f32 1.442695, %v1425_v51 }
 0x319   : > { %2771 = vpow2.f32 %v1440_v38 }
 0x323   : > { %v2772_v56 = vpop.eup %2771 }
 0x327   : > { %1718 = vperm.xlu1 %2670, %v3916_v17   ;;  %v1583_v17 = vpop.permute.xlu0 %1582 }
 0x328   : > { %v1599_v40 = vmul.f32 %v1583_v17, %v3877_v11 }
 0x32b   : > { %1454 = vperm.xlu1 %2670, %v2766_v27   ;;  %v1452_v44 = vpop.permute.xlu0 %1451 }
 0x32c   : > { %v1477_v0 = vrot.slane %v1452_v44, %v3840_v42 }
 0x32f   : > { %1460 = vperm.xlu1 %2670, %v2768_v14   ;;  %v1458_v9 = vpop.permute.xlu0 %1457 }
 0x330   : > { %v1485_v62 = vrot.slane %v1458_v9, %v3840_v42 }
 0x333   : > { %1466 = vperm.xlu1 %2670, %v2770_v19   ;;  %v1464_v59 = vpop.permute.xlu0 %1463 }
 0x334   : > { %v1493_v60 = vrot.slane %v1464_v59, %v3840_v42 }
 0x337   : > { %1472 = vperm.xlu1 %2670, %v2772_v56   ;;  %v1470_v47 = vpop.permute.xlu0 %1469 }
 0x338   : > { %v1501_v24 = vrot.slane %v1470_v47, %v3840_v42 }
 0x33b   : > { %1612 = vperm.xlu1 %2670, %v1593_v53   ;;  %v1610_v61 = vpop.permute.xlu0 %1609 }
 0x33c   : > { %v1635_v54 = vrot.slane %v1610_v61, %v3840_v42 }
 0x33f   : > { %1618 = vperm.xlu1 %2670, %v1595_v35   ;;  %v1616_v25 = vpop.permute.xlu0 %1615 }
 0x340   : > { %v1643_v34 = vrot.slane %v1616_v25, %v3840_v42 }
 0x343   : > { %1624 = vperm.xlu1 %2670, %v1597_v58   ;;  %v1622_v51 = vpop.permute.xlu0 %1621 }
 0x344   : > { %v1651_v19 = vrot.slane %v1622_v51, %v3840_v42 }
 0x347   : > { %1630 = vperm.xlu1 %2670, %v1599_v40   ;;  %v1628_v53 = vpop.permute.xlu0 %1627 }
 0x348   : > { %v1659_v40 = vrot.slane %v1628_v53, %v3840_v42 }
 0x379   : > { %v2073_v48 = vpop.trf.xlu1 }
 0x37a   : > { %2528 = vmatmul.mubr.msk.f32.vlgmr.msra.gmra.mrb[2].mxu1 %vm1373_vm9, %v2073_v48 }
 0x37b   : > { %2174 = vmatprep.mubr.f32.mxu1 %v2928_v5 }
 0x37d   : > { %v2074_v63 = vpop.trf.xlu1 }
 0x37e   : > { %2529 = vmatmul.mubr.msk.f32.gmra.mrb[4].mxu1 %vm1373_vm9, %v2074_v63 }
 0x37f   : > { %2180 = vmatprep.mubr.f32.mxu1 %v2928_v5 }
 0x381   : > { %v2075_v18 = vpop.trf.xlu1 }
 0x382   : > { %2530 = vmatmul.mubr.msk.f32.gmra.mrb[6].mxu1 %vm1373_vm9, %v2075_v18 }
 0x383   : > { %2186 = vmatprep.mubr.f32.mxu1 %v2928_v5 }
 0x385   : > { %v2076_v50 = vpop.trf.xlu1 }
 0x386   : > { %2531 = vmatmul.mubr.msk.f32.gmra.mrb[8].mxu1 %vm1373_vm9, %v2076_v50 }
 0x387   : > { %2192 = vmatprep.mubr.f32.mxu1 %v2928_v5 }
 0x389   : > { %v2077_v11 = vpop.trf.xlu1 }
 0x38a   : > { %2532 = vmatmul.mubr.msk.f32.gmra.mrb[10].mxu1 %vm1373_vm9, %v2077_v11 }
 0x3a6   : > { %v1719_v13 = vpop.permute.xlu1 %1718 }
 0x3a7   : > { %v1748_v26 = vrot.slane %v1719_v13, %v3840_v42 }
 0x3a9   : > { %v1764_v20 = vsel %vm1364_vm5, %v1748_v26, %v3945_v2 }
 0x3aa   : > { %v1765_v57 = vsel %vm1366_vm6, %v1752_v39, %v1764_v20  ;;  %v1455_v52 = vpop.permute.xlu1 %1454 }
 0x3ab   : > { %v1481_v28 = vrot.slane %v1455_v52, %v3840_v42  ;;  %v1766_v46 = vsel %vm1368_vm7, %v1756_v21, %v1765_v57 }
 0x3ac   : > { %v1767_v36 = vsel %vm1370_vm8, %v1760_v16, %v1766_v46 }
 0x3ad   : > { %v1506_v30 = vsel %vm1358_vm2, %v1481_v28, %v1477_v0  ;;  %v1768_v31 = vsel %vm1373_vm9, %v1767_v36, 2147483647 }
 0x3ae   : > { %v1461_v8 = vpop.permute.xlu1 %1460  ;;  %v1770_v6 = vshra.s32 %v1768_v31, 16  ;;  %v1507_v10 = vsel %vm1360_vm3, %v1485_v62, %v1506_v30  ;;  %v1769_v26 = vand.u32 65535, %v1768_v31 }
 0x3af   : > { %v1489_v2 = vrot.slane %v1461_v8, %v3840_v42 }
 0x3b0   : > { %v1772_v37 = vcvt.s32.f32 %v1770_v6  ;;  %v1771_v21 = vcvt.s32.f32 %v1769_v26 }
 0x3b1   : > { %v1508_v45 = vsel %vm1362_vm4, %v1489_v2, %v1507_v10 }
 0x3b2   : > { %1773 = vmin.xlane.f32.xlu0 %v1772_v37  ;;  %v1467_v23 = vpop.permute.xlu1 %1466  ;;  %v1509_v3 = vsel %vm1364_vm5, %v1493_v60, %v1508_v45 }
 0x3b3   : > { %v1497_v32 = vrot.slane %v1467_v23, %v3840_v42 }
 0x3b5   : > { %v1510_v29 = vsel %vm1366_vm6, %v1497_v32, %v1509_v3 }
 0x3b6   : > { %v1473_v12 = vpop.permute.xlu1 %1472  ;;  %v1511_v22 = vsel %vm1368_vm7, %v1501_v24, %v1510_v29 }
 0x3b7   : > { %v1505_v33 = vrot.slane %v1473_v12, %v3840_v42 }
 0x3b9   : > { %v1512_v7 = vsel %vm1370_vm8, %v1505_v33, %v1511_v22 }
 0x3ba   : > { %v1613_v43 = vpop.permute.xlu1 %1612  ;;  %v1514_v1 = vsel %vm1373_vm9, %v1512_v7, 0.0 }
 0x3bb   : > { %v1639_v15 = vrot.slane %v1613_v43, %v3840_v42  ;;  %1515 = vadd.xlane.f32.xlu1 %v1514_v1 }
 0x3bd   : > { %v1664_v4 = vsel %vm1358_vm2, %v1639_v15, %v1635_v54  ;;  %vm493_vm2 = vcmask 319488  }
 0x3be   : > { %v1619_v41 = vpop.permute.xlu1 %1618  ;;  %v1665_v27 = vsel %vm1360_vm3, %v1643_v34, %v1664_v4  ;;  %494 = vst.msk [vmem:[%s4040_s26] sm:$0x1] %vm493_vm2, %v2928_v5 }
 0x3bf   : > { %v1647_v38 = vrot.slane %v1619_v41, %v3840_v42 }
 0x3c1   : > { %v1666_v14 = vsel %vm1362_vm4, %v1647_v38, %v1665_v27 }
 0x3c2   : > { %v1625_v56 = vpop.permute.xlu1 %1624  ;;  %v1667_v58 = vsel %vm1364_vm5, %v1651_v19, %v1666_v14 }
 0x3c3   : > { %v1655_v35 = vrot.slane %v1625_v56, %v3840_v42 }
 0x3c5   : > { %v1668_v17 = vsel %vm1366_vm6, %v1655_v35, %v1667_v58 }
 0x3c6   : > { %v1631_v49 = vpop.permute.xlu1 %1630  ;;  %v1669_v63 = vsel %vm1368_vm7, %v1659_v40, %v1668_v17 }
 0x3c7   : > { %v1663_v48 = vrot.slane %v1631_v49, %v3840_v42  ;;  %v2219_v42 = vld [vmem:[%s4040_s26] sm:$0x1] }
 0x3c9   : > { %v1670_v18 = vsel %vm1370_vm8, %v1663_v48, %v1669_v63 }
 0x3ca   : > { %v1672_v50 = vsel %vm1373_vm9, %v1670_v18, 0.0 }
 0x3cb   : > { %1673 = vadd.xlane.f32.xlu0 %v1672_v50 }
 0x3cd   : > { %v2289_v11 = vpop.f32.mrb[4].mxu0 }
 0x3ce   : > { %v2293_v13 = vadd.f32 %v2289_v11, %v2219_v42  ;;  %v2571_v44 = vpop.f32.mrb[5].mxu0 }
 0x3d0   : > { %2295 = vst.msk [vmem:[%s4040_s26] sm:$0x1] %vm493_vm2, %v2293_v13  ;;  %s2932_s26 = smov [#allocation7]  }
 0x3d1   : > { %s2811_s0 = sshll.u32 %s2932_s26, 4  ;;  %s2812_s0 = int_to_ptr.vmem [resolvable:$false] %s2811_s0 }
 0x3d2   : > { %s2813_s1 = scalar_lea.vmem %s2812_s0, 32  ;;  %p2814_p1 = scmp.lt.s32.totalorder %s4067_s15, %s2812_s0 }
 0x3d3   : > { %p2815_p3 = scmp.lt.s32.totalorder %s2813_s1, %s2807_s27 }
 0x3d5   : > { %p2816_p5 = por %p2815_p3, %p2814_p1 }
 0x3d7   : > { %p2817_p6 = pnand %p2816_p5, %p2810_p13 }
 0x43f   : > { %v4046_v39 = vpop.xlane.xlu0 %1773 }
 0x440   : > { %vm1775_vm3 = vcmp.eq.f32.partialorder %v1772_v37, %v4046_v39 }
 0x441   : > { %v1776_v20 = vsel %vm1775_vm3, %v1771_v21, inf }
 0x442   : > { %1777 = vmin.xlane.f32.xlu0 %v1776_v20 }
 0x448   : > { %v1516_v16 = vpop.xlane.xlu1 %1515 }
 0x449   : > { %2773 = vlog2.f32 %v1516_v16 }
 0x44d   : > { %v2170_v57 = vpop.f32.mrb[2].mxu1 }
 0x44e   : > { %v2172_v52 = vpop.f32.mrb[3].mxu1  ;;  %2209 = vst [vmem:[%s4050_s14] sm:$0xff] %v2170_v57 }
 0x44f   : > { %2210 = vst [vmem:[%s4050_s14 + $0x8] sm:$0xff] %v2172_v52 }
 0x451   : > { %v2176_v5 = vpop.f32.mrb[4].mxu1 }
 0x452   : > { %v2178_v0 = vpop.f32.mrb[5].mxu1  ;;  %2211 = vst [vmem:[%s4050_s14 + $0x10] sm:$0xff] %v2176_v5 }
 0x453   : > { %v2774_v9 = vpop.eup %2773  ;;  %2212 = vst [vmem:[%s4050_s14 + $0x18] sm:$0xff] %v2178_v0 }
 0x454   : > { %v1518_v28 = vmul.f32 0.6931472, %v2774_v9 }
 0x455   : > { %v2182_v46 = vpop.f32.mrb[6].mxu1 }
 0x456   : > { %v1519_v36 = vadd.f32 %v1518_v28, %v3890_v55  ;;  %v2184_v30 = vpop.f32.mrb[7].mxu1  ;;  %2213 = vst [vmem:[%s4050_s14 + $0x20] sm:$0xff] %v2182_v46 }
 0x457   : > { %2214 = vst [vmem:[%s4050_s14 + $0x28] sm:$0xff] %v2184_v30 }
 0x458   : > { %v1674_v31 = vpop.xlane.xlu0 %1673 }
 0x459   : > { %v1676_v62 = vsub.f32 %v1519_v36, %v1674_v31  ;;  %v2188_v8 = vpop.f32.mrb[8].mxu1 }
 0x45a   : > { %v2190_v55 = vpop.f32.mrb[9].mxu1 }
 0x45b   : > { %2820 = shalt.err (!%p2817_p6)
}
 0x45c   : > { %s2821_s16 = scalar_lea.hbm %s4065_s13, 16  ;;  %s2825_s26 = scalar_lea.hbm %s4170_s10, 32 }
 0x45d   : > { %p2822_p7 = scmp.ne.s32.totalorder %s4065_s13, %s2821_s16  ;;  %p2826_p0 = scmp.lt.u32.totalorder %s4065_s13, %s4170_s10 }
 0x45e   : > { %p2827_p2 = scmp.lt.u32.totalorder %s2825_s26, %s2821_s16  ;;  %p2829_p8 = scmp.lt.u32.totalorder %s2821_s16, %s4065_s13 }
 0x45f   : > { %p2823_p9 = pnand %p2822_p7, %p4194_p10 }
 0x460   : > { %p2828_p4 = por %p2827_p2, %p2826_p0 }
 0x461   : > { %p2824_p12 = pneg %p2823_p9 }
 0x462   : > { %p2830_p11 = por %p2829_p8, %p2828_p4 }
 0x464   : > { %p2831_p13 = pnand %p2830_p11, %p2824_p12 }
 0x466   : > { %2834 = shalt.err (!%p2831_p13)
}
 0x467   : > { %2593 = dma.vmem_to_hbm [thread:$0]  (%p4194_p10), %s4067_s15, 16, %s4065_s13, %s2305_s17   ;;  %v1677_v6 = vrot.slane %v1676_v62, 4  ;;  %2215 = vst [vmem:[%s4050_s14 + $0x30] sm:$0xff] %v2188_v8  ;;  %2216 = vst [vmem:[%s4050_s14 + $0x38] sm:$0xff] %v2190_v55  ;;  %v2194_v2 = vpop.f32.mrb[10].mxu1 }
 0x468   : > { %s2325_s1 = sshll.u32 %s4050_s14, 4  ;;  %v2196_v10 = vpop.f32.mrb[11].mxu1  ;;  %s4195_s2 = smul.u32 1280, %s2913_s22  ;;  %2217 = vst [vmem:[%s4050_s14 + $0x40] sm:$0xff] %v2194_v2  ;;  %s4101_s1 = int_to_ptr.vmem [resolvable:$true] %s2325_s1 }
 0x469   : > { %v1678_v59 = vadd.f32 %v1677_v6, %v1676_v62  ;;  %2218 = vst [vmem:[%s4050_s14 + $0x48] sm:$0xff] %v2196_v10  ;;  %s2300_s17 = scalar_lea.sflag [#allocation5], %s4037_s29  ;;  %s2835_s15 = scalar_lea.vmem %s4101_s1, 1280 }
 0x46a   : > { %s4099_s18 = scalar_lea.hbm %s4169_s9, %s4195_s2  ;;  %p2836_p1 = scmp.ne.s32.totalorder %s4101_s1, %s2835_s15 }
 0x46b   : > { %v1679_v37 = vrot.slane %v1678_v59, 2  ;;  %s2933_s22 = smov [#allocation6]  }
 0x46c   : > { %p2837_p3 = pnand %p2836_p1, %p4194_p10  ;;  %s2839_s13 = sshll.u32 %s2933_s22, 4  ;;  %s2840_s13 = int_to_ptr.vmem [resolvable:$false] %s2839_s13 }
 0x46d   : > { %v1680_v45 = vadd.f32 %v1679_v37, %v1678_v59  ;;  %s2841_s25 = scalar_lea.vmem %s2840_s13, 2560  ;;  %p2842_p6 = scmp.lt.s32.totalorder %s4101_s1, %s2840_s13 }
 0x46e   : > { %p2838_p5 = pneg %p2837_p3  ;;  %p2843_p7 = scmp.lt.s32.totalorder %s2841_s25, %s2835_s15 }
 0x470   : > { %p2844_p9 = por %p2843_p7, %p2842_p6 }
 0x472   : > { %p2845_p12 = pnand %p2844_p9, %p2838_p5 }
 0x474   : > { %2848 = shalt.err (!%p2845_p12)
}
 0x475   : > { %s2849_s14 = scalar_lea.hbm %s4099_s18, 1280  ;;  %s2853_s2 = scalar_lea.hbm %s4169_s9, 2560 }
 0x476   : > { %p2850_p0 = scmp.ne.s32.totalorder %s4099_s18, %s2849_s14  ;;  %p2854_p8 = scmp.lt.u32.totalorder %s4099_s18, %s4169_s9 }
 0x477   : > { %p2855_p11 = scmp.lt.u32.totalorder %s2853_s2, %s2849_s14  ;;  %p2857_p1 = scmp.lt.u32.totalorder %s2849_s14, %s4099_s18 }
 0x478   : > { %p2851_p2 = pnand %p2850_p0, %p4194_p10 }
 0x479   : > { %p2856_p13 = por %p2855_p11, %p2854_p8 }
 0x47a   : > { %p2852_p4 = pneg %p2851_p2 }
 0x47b   : > { %p2858_p3 = por %p2857_p1, %p2856_p13 }
 0x47d   : > { %p2859_p5 = pnand %p2858_p3, %p2852_p4 }
 0x47f   : > { %2862 = shalt.err (!%p2859_p5)
}
 0x480   : > { %s2934_s15 = smov 256   ;;  %s2935_s22 = smov 16   ;;  %v1681_v60 = vrot.slane %v1680_v45, 1  ;;  %v1675_v23 = vld [vmem:[%s4031_s7] sm:$0x1]  ;;  %v1780_v3 = vcvt.f32.s32 %v4046_v39  ;;  %vm1783_vm4 = vcmask 7168  }
 0x481   : > { %2592 = dma.vmem_to_hbm [thread:$0]  (%p4194_p10), %s4101_s1, 1280, %s4099_s18, %s2300_s17, %s2934_s15, %s2934_s15, %s2935_s22  }
 0x482   : > { %v1682_v47 = vadd.f32 %v1681_v60, %v1680_v45  ;;  %v1781_v24 = vshll.u32 %v1780_v3, 16  ;;  %s4196_s13 = sshll.u32 %s3094_s23, 3 }
 0x483   : > { %s475_s26 = scalar_lea.vmem %s4171_s11, %s4196_s13 }
 0x484   : > { %v1683_v32 = vadd.f32 %v1682_v47, %v1675_v23 }
 0x486   : > { %1685 = vst.msk [vmem:[%s4031_s7] sm:$0x1] %vm481_vm0, %v1683_v32 }
 0x4cf   : > { %v1778_v29 = vpop.xlane.xlu0 %1777 }
 0x4d0   : > { %v1779_v12 = vcvt.f32.s32 %v1778_v29 }
 0x4d2   : > { %v1782_v61 = vadd.s32 %v1781_v24, %v1779_v12 }
 0x4d4   : > { %1784 = vst.msk [vmem:[%s475_s26] sm:$0xff] %vm1783_vm4, %v1782_v61 }
 0x4d5 PF: > { %p2609_p10 = scmp.ge.s32.totalorder %s2921_s24, 2  ;;  %s2363_s28 = sand.u32 1, %s2901_s19  }
 0x4d6   : > { %p4197_p6 = scmp.ne.s32.totalorder %s4185_s30, 0  ;;  %s2364_s7 = scalar_lea.sflag [#allocation5], %s2363_s28 }
 0x4d8   : > { %p2601_p7 = pnand %p2609_p10, %p4197_p6 }
 0x4da   : > { %2892 = dma.done.wait (!%p2601_p7), %s2364_s7, 1280  }
 0x4db   : > { %2894 = vsyncadd (!%p2601_p7), %s2364_s7, 4294966016  ;;  %s2373_s29 = scalar_lea.sflag [#allocation8], %s2363_s28 }
 0x4dc   : > { %2896 = dma.done.wait (!%p2601_p7), %s2373_s29, 16  }
 0x4dd   : > { %2898 = vsyncadd (!%p2601_p7), %s2373_s29, 4294967280  ;;  %s30_s24 = sadd.s32 1, %s2921_s24   ;;  %s4198_s22 = sld [smem:[#allocation12_spill]] }
 0x4de   : > { %p27_p9 = scmp.ge.s32.totalorder %s30_s24, 4   ;;  %s4199_s23 = sld [smem:[#allocation13_spill]] }
 0x4df   : > { %s4200_s19 = smov %s2905_s20  ;;  %s4201_s20 = smov %s2909_s21 }
 0x4e0   : > { %s4202_s21 = smov %s3052_s12  ;;  %29 = sbr.rel (!%p27_p9) target bundleno = 12 (0xc), region = 145 }
 0x4e7   :  { %2385 = vsyncpa [#allocation4], 1 }
 0x4e8   :  { %2387 = vsyncpa [#allocation4 + $0x1], 1 }
 0x4e9   :  { %2388 = vsyncpa [#allocation5], 1 }
 0x4ea   :  { %2390 = vsyncpa [#allocation5 + $0x1], 1 }
 0x4eb   :  { %2391 = vsyncpa [#allocation8], 1 }
 0x4ec   :  { %2393 = vsyncpa [#allocation8 + $0x1], 1 }

</bundles_post_ra>
